<compile_context>
chip_gen: v7x
topology: tpu7x:2x2x1
jax: 0.10.0
libtpu: 0.0.40
codegen_flags: <defaults>
</compile_context>

<pallas_src>
import math
from functools import partial

import jax
import jax.numpy as jnp
from jax import lax
from jax.experimental import pallas as pl
from jax.experimental.pallas import tpu as pltpu


# ---------------------------------------------------------------------------
# Fused Pallas kernel: all GRU layers + dense + sigmoid, one T-chunk per grid step
# ---------------------------------------------------------------------------
def _nsnet_kernel(Tc, B, L, Fp,
                  x_ref, wih_ref, whh_ref, bi_ref, bhn_ref, wd_ref, bd_ref,
                  out_ref, h_ref, seq_ref, gi_ref):
    """One T-chunk of the fused NSNet forward.

    x_ref   : (Tc*B, Fp)    time-major input rows for this chunk (f32)
    wih_ref : (L, Fp, 3Fp)  per-layer concatenated transposed W_ih [r|z|n]  (bf16)
    whh_ref : (L, Fp, 3Fp)  per-layer concatenated transposed W_hh [r|z|n]  (bf16)
    bi_ref  : (L, 1, 3Fp)   [b_ih_r+b_hh_r | b_ih_z+b_hh_z | b_ih_n]        (f32)
    bhn_ref : (L, 1, Fp)    b_hh_n                                           (f32)
    wd_ref  : (Fp, Fp)      transposed dense weight                          (bf16)
    bd_ref  : (1, Fp)       dense bias                                       (f32)
    out_ref : (Tc*B, Fp)    sigmoid(dense(gru(x))) for this chunk            (f32)
    h_ref   : (L, B, Fp)    VMEM scratch: per-layer hidden state carried across chunks
    seq_ref : (Tc*B, Fp)    VMEM scratch: current layer's chunk sequence
    gi_ref  : (Tc*B, 3Fp)   VMEM scratch: hoisted input-side gates for current layer
    """
    c = pl.program_id(0)

    @pl.when(c == 0)
    def _():  # h0 = 0 for every layer (matches torch.nn.GRU)
        h_ref[...] = jnp.zeros_like(h_ref)

    seq_ref[...] = x_ref[...]

    for l in range(L):                                   # static unroll over layers
        # Hoisted input-side gates for the whole chunk: ONE fused MXU op per layer,
        # result parked in VMEM (not held live across the unrolled time loop).
        seq_bf = seq_ref[...].astype(jnp.bfloat16)
        gi_ref[...] = (jnp.dot(seq_bf, wih_ref[l],
                               preferred_element_type=jnp.float32) + bi_ref[l])

        w_hh = whh_ref[l]                                # (Fp, 3Fp) bf16, reused all steps
        b_hn = bhn_ref[l]                                # (1, Fp)
        h = h_ref[l]                                     # (B, Fp) f32 carried hidden state

        hs = []
        for t in range(Tc):                              # static unroll over chunk steps
            lo = t * B
            # Single fused hidden-side matmul on the serial critical path.
            gh = jnp.dot(h.astype(jnp.bfloat16), w_hh,
                         preferred_element_type=jnp.float32)        # (B, 3Fp)
            gi = gi_ref[lo:lo + B, :]                                # (B, 3Fp) VMEM load

            r = jax.nn.sigmoid(gi[:, :Fp] + gh[:, :Fp])
            z = jax.nn.sigmoid(gi[:, Fp:2 * Fp] + gh[:, Fp:2 * Fp])
            n = jnp.tanh(gi[:, 2 * Fp:] + r * (gh[:, 2 * Fp:] + b_hn))
            h = (1.0 - z) * n + z * h
            hs.append(h)

        h_ref[l] = h                                     # carry to next chunk
        # One contiguous, lane/sublane-dense store of the layer's chunk sequence.
        seq_ref[...] = jnp.concatenate(hs, axis=0)

    # Dense + sigmoid head on the chunk; one contiguous lane-dense output store.
    y = jnp.dot(seq_ref[...].astype(jnp.bfloat16), wd_ref[...],
                preferred_element_type=jnp.float32) + bd_ref[...]
    out_ref[...] = jax.nn.sigmoid(y)


def _pick_t_chunk(T, B, max_rows=4096):
    """Largest divisor Tc of T with Tc*B a sublane multiple (or Tc == T) and
    Tc*B <= max_rows (bounds VMEM; important on v7x's 64 MiB)."""
    best = T
    for tc in range(1, T + 1):
        if T % tc:
            continue
        rows = tc * B
        if rows > max_rows:
            continue
        if rows % 8 == 0 or tc == T:
            best = tc
    return best


def nsnet_pallas(x2d, prep, *, T, B, t_chunk):
    TB, Fp = x2d.shape
    L = prep["bhn"].shape[0]
    assert T % t_chunk == 0, "t_chunk must divide T"
    Tc = t_chunk
    nc = T // Tc
    rows = Tc * B

    kernel = partial(_nsnet_kernel, Tc, B, L, Fp)
    return pl.pallas_call(
        kernel,
        out_shape=jax.ShapeDtypeStruct((TB, Fp), jnp.float32),
        grid_spec=pltpu.PrefetchScalarGridSpec(
            num_scalar_prefetch=0,
            grid=(nc,),
            in_specs=[
                pl.BlockSpec((rows, Fp), lambda c: (c, 0)),          # x chunk
                pl.BlockSpec((L, Fp, 3 * Fp), lambda c: (0, 0, 0)),  # W_ih (constant -> DMA once)
                pl.BlockSpec((L, Fp, 3 * Fp), lambda c: (0, 0, 0)),  # W_hh
                pl.BlockSpec((L, 1, 3 * Fp), lambda c: (0, 0, 0)),   # fused r/z/n biases
                pl.BlockSpec((L, 1, Fp), lambda c: (0, 0, 0)),       # b_hh_n
                pl.BlockSpec((Fp, Fp), lambda c: (0, 0)),            # dense W
                pl.BlockSpec((1, Fp), lambda c: (0, 0)),             # dense b
            ],
            out_specs=pl.BlockSpec((rows, Fp), lambda c: (c, 0)),
            scratch_shapes=[
                pltpu.VMEM((L, B, Fp), jnp.float32),      # carried hidden states
                pltpu.VMEM((rows, Fp), jnp.float32),      # layer chunk sequence
                pltpu.VMEM((rows, 3 * Fp), jnp.float32),  # hoisted input gates
            ],
        ),
        # T-chunk axis carries state -> must stay sequential ("arbitrary").
        compiler_params=pltpu.CompilerParams(
            dimension_semantics=("arbitrary",)),
    )(x2d, prep["wih"], prep["whh"], prep["bi"], prep["bhn"],
      prep["wd"], prep["bd"])


# ---------------------------------------------------------------------------
# Parameters: PyTorch-shaped init + one-time kernel-layout preparation
# ---------------------------------------------------------------------------
def init_nsnet_params(key, input_dim, n_gru_layers):
    """Deterministic init matching PyTorch shapes (uniform(-1/sqrt(H), 1/sqrt(H)))."""
    F = input_dim
    k = 1.0 / math.sqrt(F)
    params = {"gru": [], "dense": {}}
    for _ in range(n_gru_layers):
        key, k1, k2, k3, k4 = jax.random.split(key, 5)
        params["gru"].append({
            "w_ih": jax.random.uniform(k1, (3 * F, F), jnp.float32, -k, k),
            "w_hh": jax.random.uniform(k2, (3 * F, F), jnp.float32, -k, k),
            "b_ih": jax.random.uniform(k3, (3 * F,), jnp.float32, -k, k),
            "b_hh": jax.random.uniform(k4, (3 * F,), jnp.float32, -k, k),
        })
    key, k1, k2 = jax.random.split(key, 3)
    params["dense"]["w"] = jax.random.uniform(k1, (F, F), jnp.float32, -k, k)
    params["dense"]["b"] = jax.random.uniform(k2, (F,), jnp.float32, -k, k)
    return params


def prepare_params(params):
    """One-time, off-the-hot-path layout prep:
      * transpose + per-gate split + concat to a single (Fp, 3Fp) block per layer
      * fold b_ih+b_hh for r/z gates; keep b_ih_n in the fused bias, b_hh_n separate
      * zero-pad F to a multiple of 128 lanes (lane-dense vregs / MXU tiles / stores)
      * cast matmul weights to bf16 (MXU-native); biases stay f32.
    Padded columns stay exactly 0 through the GRU (sigmoid(0)=.5, tanh(0)=0, h0=0),
    so they never contaminate real features; the wrapper slices them off."""
    F = params["dense"]["w"].shape[0]
    Fp = ((F + 127) // 128) * 128

    def pad_w(w):     # (F, F) -> (Fp, Fp), already "x @ W" oriented
        return jnp.zeros((Fp, Fp), jnp.float32).at[:F, :F].set(w)

    def pad_b(b):     # (F,) -> (Fp,)
        return jnp.zeros((Fp,), jnp.float32).at[:F].set(b)

    wih_l, whh_l, bi_l, bhn_l = [], [], [], []
    for layer in params["gru"]:
        w_ih, w_hh = layer["w_ih"], layer["w_hh"]
        b_ih, b_hh = layer["b_ih"], layer["b_hh"]
        wih_g, whh_g = [], []
        for g in range(3):                           # torch gate order r, z, n
            wih_g.append(pad_w(w_ih[g * F:(g + 1) * F, :].T))
            whh_g.append(pad_w(w_hh[g * F:(g + 1) * F, :].T))
        wih_l.append(jnp.concatenate(wih_g, axis=1))             # (Fp, 3Fp)
        whh_l.append(jnp.concatenate(whh_g, axis=1))             # (Fp, 3Fp)
        bi_l.append(jnp.concatenate([
            pad_b(b_ih[:F] + b_hh[:F]),                          # r: fold both biases
            pad_b(b_ih[F:2 * F] + b_hh[F:2 * F]),                # z: fold both biases
            pad_b(b_ih[2 * F:]),                                 # n: input-side bias only
        ]).reshape(1, 3 * Fp))
        bhn_l.append(pad_b(b_hh[2 * F:]).reshape(1, Fp))         # n: hidden-side bias

    return {
        "wih": jnp.stack(wih_l, 0).astype(jnp.bfloat16),   # (L, Fp, 3Fp)
        "whh": jnp.stack(whh_l, 0).astype(jnp.bfloat16),   # (L, Fp, 3Fp)
        "bi": jnp.stack(bi_l, 0),                          # (L, 1, 3Fp) f32
        "bhn": jnp.stack(bhn_l, 0),                        # (L, 1, Fp)  f32
        "wd": pad_w(params["dense"]["w"].T).astype(jnp.bfloat16),  # (Fp, Fp)
        "bd": pad_b(params["dense"]["b"]).reshape(1, Fp),          # (1, Fp) f32
    }


# ---------------------------------------------------------------------------
# Forward pass (jit-ed): (B, F, T) -> (B, F, T)
# ---------------------------------------------------------------------------
@partial(jax.jit, static_argnames=("t_chunk",))
def nsnet_forward(prep, x_bft, t_chunk=None):
    B, F, T = x_bft.shape
    Fp = prep["wd"].shape[0]
    if t_chunk is None:
        t_chunk = _pick_t_chunk(T, B)
    # torch: x.permute(0,2,1) -> (B, T, F); kernel uses time-major (T*B, Fp), F padded.
    x_tbf = jnp.transpose(x_bft, (2, 0, 1)).astype(jnp.float32)       # (T, B, F)
    x2d = jnp.pad(x_tbf, ((0, 0), (0, 0), (0, Fp - F))).reshape(T * B, Fp)
    y2d = nsnet_pallas(x2d, prep, T=T, B=B, t_chunk=t_chunk)          # (T*B, Fp)
    y = y2d.reshape(T, B, Fp)[:, :, :F]                               # drop lane padding
    return jnp.transpose(y, (1, 2, 0))                                # back to (B, F, T)


# ---------------------------------------------------------------------------
# Pure-JAX f32 reference (correctness sanity check)
# ---------------------------------------------------------------------------
def nsnet_reference(params, x_bft):
    B, F, T = x_bft.shape
    x = jnp.transpose(x_bft, (0, 2, 1)).astype(jnp.float32)           # (B, T, F)

    def gru_layer_ref(x_btf, layer):
        w_ih, w_hh = layer["w_ih"], layer["w_hh"]
        b_ih, b_hh = layer["b_ih"], layer["b_hh"]

        def step(h, x_t):
            gi = x_t @ w_ih.T + b_ih
            gh = h @ w_hh.T + b_hh
            r = jax.nn.sigmoid(gi[:, :F] + gh[:, :F])
            z = jax.nn.sigmoid(gi[:, F:2 * F] + gh[:, F:2 * F])
            n = jnp.tanh(gi[:, 2 * F:] + r * gh[:, 2 * F:])
            h_new = (1.0 - z) * n + z * h
            return h_new, h_new

        h0 = jnp.zeros((x_btf.shape[0], F), jnp.float32)
        _, ys = lax.scan(step, h0, jnp.transpose(x_btf, (1, 0, 2)))
        return jnp.transpose(ys, (1, 0, 2))

    h = x
    for layer in params["gru"]:
        h = gru_layer_ref(h, layer)
    y = jax.nn.sigmoid(h @ params["dense"]["w"].T + params["dense"]["b"])
    return jnp.transpose(y, (0, 2, 1))


# ---------------------------------------------------------------------------
if __name__ == "__main__":
    B, F, T = 2, 32, 8
    N_GRU_LAYERS = 2
    GRU_DROPOUT = 0.0  # inference: dropout inactive

    key = jax.random.PRNGKey(0)
    key, pkey, xkey = jax.random.split(key, 3)
    params = init_nsnet_params(pkey, F, N_GRU_LAYERS)
    prep = prepare_params(params)  # one-time layout prep, off the hot path
    x = jax.random.normal(xkey, (B, F, T), jnp.float32)

    ref = jax.block_until_ready(nsnet_reference(params, x))

    # Chunked grid (exercises the cross-chunk h carry) and single-chunk variants.
    out_chunked = jax.block_until_ready(nsnet_forward(prep, x, t_chunk=4))
    out_single = jax.block_until_ready(nsnet_forward(prep, x, t_chunk=T))

    assert out_chunked.shape == (B, F, T)
    # bf16 MXU operands -> slightly looser tolerance vs. the f32 reference.
    assert jnp.allclose(out_chunked, ref, atol=2e-2, rtol=2e-2), "chunked mismatch vs reference"
    assert jnp.allclose(out_single, ref, atol=2e-2, rtol=2e-2), "single-chunk mismatch vs reference"
    assert jnp.allclose(out_chunked, out_single, atol=1e-5, rtol=1e-5), "chunking changed result"
    print("KERNEL_OK")
</pallas_src>

<mosaic_0001>
module attributes {stable_mosaic.version = 11 : i64} {
  func.func @_nsnet_kernel(%arg0: i32, %arg1: memref<8x128xf32, #tpu.memory_space<vmem>>, %arg2: memref<2x128x384xbf16, #tpu.memory_space<vmem>>, %arg3: memref<2x128x384xbf16, #tpu.memory_space<vmem>>, %arg4: memref<2x1x384xf32, #tpu.memory_space<vmem>>, %arg5: memref<2x1x128xf32, #tpu.memory_space<vmem>>, %arg6: memref<128x128xbf16, #tpu.memory_space<vmem>>, %arg7: memref<1x128xf32, #tpu.memory_space<vmem>>, %arg8: memref<8x128xf32, #tpu.memory_space<vmem>>, %arg9: memref<2x2x128xf32, #tpu.memory_space<vmem>>, %arg10: memref<8x128xf32, #tpu.memory_space<vmem>>, %arg11: memref<8x384xf32, #tpu.memory_space<vmem>>) attributes {dimension_semantics = [#tpu.dimension_semantics<arbitrary>], iteration_bounds = array<i64: 2>, scalar_prefetch = 0 : i64, scratch_operands = 3 : i64, tpu.core_type = #tpu.core_type<tc>, window_params = [{transform_indices = @transform_0, window_bounds = array<i64: 8, 128>}, {pipeline_mode = #tpu.pipeline_mode<synchronous>, transform_indices = @transform_1, window_bounds = array<i64: 2, 128, 384>}, {pipeline_mode = #tpu.pipeline_mode<synchronous>, transform_indices = @transform_2, window_bounds = array<i64: 2, 128, 384>}, {pipeline_mode = #tpu.pipeline_mode<synchronous>, transform_indices = @transform_3, window_bounds = array<i64: 2, 1, 384>}, {pipeline_mode = #tpu.pipeline_mode<synchronous>, transform_indices = @transform_4, window_bounds = array<i64: 2, 1, 128>}, {pipeline_mode = #tpu.pipeline_mode<synchronous>, transform_indices = @transform_5, window_bounds = array<i64: 128, 128>}, {pipeline_mode = #tpu.pipeline_mode<synchronous>, transform_indices = @transform_6, window_bounds = array<i64: 1, 128>}, {transform_indices = @transform_7, window_bounds = array<i64: 8, 128>}]} {
    %c0_i32 = arith.constant 0 : i32
    %0 = arith.cmpi eq, %arg0, %c0_i32 : i32
    %1 = arith.extui %0 : i1 to i32
    %c0_i32_0 = arith.constant 0 : i32
    %2 = arith.cmpi ne, %1, %c0_i32_0 : i32
    scf.if %2 {
      %cst_107 = arith.constant 0.000000e+00 : f32
      %308 = vector.broadcast %cst_107 : f32 to vector<2x2x128xf32>
      %c0_108 = arith.constant 0 : index
      %c0_109 = arith.constant 0 : index
      %c0_110 = arith.constant 0 : index
      %309 = vector.load %arg9[%c0_108, %c0_109, %c0_110] : memref<2x2x128xf32, #tpu.memory_space<vmem>>, vector<2x2x128xf32>
      tpu.vector_store %arg9[%c0_108, %c0_109, %c0_110], %308 {strides = array<i32>} : memref<2x2x128xf32, #tpu.memory_space<vmem>>, vector<2x2x128xf32>,
    } else {
    }
    %c0 = arith.constant 0 : index
    %c0_1 = arith.constant 0 : index
    %3 = vector.load %arg1[%c0, %c0_1] : memref<8x128xf32, #tpu.memory_space<vmem>>, vector<8x128xf32>
    %c0_2 = arith.constant 0 : index
    %c0_3 = arith.constant 0 : index
    %4 = vector.load %arg10[%c0_2, %c0_3] : memref<8x128xf32, #tpu.memory_space<vmem>>, vector<8x128xf32>
    tpu.vector_store %arg10[%c0_2, %c0_3], %3 {strides = array<i32>} : memref<8x128xf32, #tpu.memory_space<vmem>>, vector<8x128xf32>,
    %c0_4 = arith.constant 0 : index
    %c0_5 = arith.constant 0 : index
    %5 = vector.load %arg10[%c0_4, %c0_5] : memref<8x128xf32, #tpu.memory_space<vmem>>, vector<8x128xf32>
    %6 = arith.truncf %5 : vector<8x128xf32> to vector<8x128xbf16>
    %c0_6 = arith.constant 0 : index
    %c0_7 = arith.constant 0 : index
    %c0_8 = arith.constant 0 : index
    %7 = vector.load %arg2[%c0_6, %c0_7, %c0_8] : memref<2x128x384xbf16, #tpu.memory_space<vmem>>, vector<1x128x384xbf16>
    %8 = vector.shape_cast %7 : vector<1x128x384xbf16> to vector<128x384xbf16>
    %cst = arith.constant dense<0.000000e+00> : vector<8x384xf32>
    %9 = tpu.matmul %6, %8, %cst {dimension_numbers = #tpu.dot_dimension_numbers<[1], [0], [0], [1], [0, 0, 1, 1], [], []>} : vector<8x128xbf16>, vector<128x384xbf16>, vector<8x384xf32> -> vector<8x384xf32>
    %c0_9 = arith.constant 0 : index
    %c0_10 = arith.constant 0 : index
    %c0_11 = arith.constant 0 : index
    %10 = vector.load %arg4[%c0_9, %c0_10, %c0_11] : memref<2x1x384xf32, #tpu.memory_space<vmem>>, vector<1x1x384xf32>
    %11 = vector.shape_cast %10 : vector<1x1x384xf32> to vector<1x384xf32>
    %12 = vector.broadcast %11 : vector<1x384xf32> to vector<8x384xf32>
    %13 = arith.addf %9, %12 : vector<8x384xf32>
    %c0_12 = arith.constant 0 : index
    %c0_13 = arith.constant 0 : index
    %14 = vector.load %arg11[%c0_12, %c0_13] : memref<8x384xf32, #tpu.memory_space<vmem>>, vector<8x384xf32>
    tpu.vector_store %arg11[%c0_12, %c0_13], %13 {strides = array<i32>} : memref<8x384xf32, #tpu.memory_space<vmem>>, vector<8x384xf32>,
    %c0_14 = arith.constant 0 : index
    %c0_15 = arith.constant 0 : index
    %c0_16 = arith.constant 0 : index
    %15 = vector.load %arg3[%c0_14, %c0_15, %c0_16] : memref<2x128x384xbf16, #tpu.memory_space<vmem>>, vector<1x128x384xbf16>
    %16 = vector.shape_cast %15 : vector<1x128x384xbf16> to vector<128x384xbf16>
    %c0_17 = arith.constant 0 : index
    %c0_18 = arith.constant 0 : index
    %c0_19 = arith.constant 0 : index
    %17 = vector.load %arg5[%c0_17, %c0_18, %c0_19] : memref<2x1x128xf32, #tpu.memory_space<vmem>>, vector<1x1x128xf32>
    %18 = vector.shape_cast %17 : vector<1x1x128xf32> to vector<1x128xf32>
    %c0_20 = arith.constant 0 : index
    %c0_21 = arith.constant 0 : index
    %c0_22 = arith.constant 0 : index
    %19 = vector.load %arg9[%c0_20, %c0_21, %c0_22] : memref<2x2x128xf32, #tpu.memory_space<vmem>>, vector<1x2x128xf32>
    %20 = vector.shape_cast %19 : vector<1x2x128xf32> to vector<2x128xf32>
    %21 = arith.truncf %20 : vector<2x128xf32> to vector<2x128xbf16>
    %cst_23 = arith.constant dense<0.000000e+00> : vector<2x384xf32>
    %22 = tpu.matmul %21, %16, %cst_23 {dimension_numbers = #tpu.dot_dimension_numbers<[1], [0], [0], [1], [0, 0, 1, 1], [], []>} : vector<2x128xbf16>, vector<128x384xbf16>, vector<2x384xf32> -> vector<2x384xf32>
    %c0_24 = arith.constant 0 : index
    %c0_25 = arith.constant 0 : index
    %23 = vector.load %arg11[%c0_24, %c0_25] : memref<8x384xf32, #tpu.memory_space<vmem>>, vector<2x384xf32>
    %24 = vector.extract_strided_slice %23 {offsets = [0, 0], sizes = [2, 128], strides = [1, 1]} : vector<2x384xf32> to vector<2x128xf32>
    %25 = vector.extract_strided_slice %22 {offsets = [0, 0], sizes = [2, 128], strides = [1, 1]} : vector<2x384xf32> to vector<2x128xf32>
    %26 = arith.addf %24, %25 : vector<2x128xf32>
    %27 = arith.negf %26 : vector<2x128xf32>
    %28 = math.exp %27 : vector<2x128xf32>
    %cst_26 = arith.constant 1.000000e+00 : f32
    %29 = vector.broadcast %cst_26 : f32 to vector<2x128xf32>
    %30 = arith.addf %29, %28 : vector<2x128xf32>
    %31 = arith.divf %29, %30 : vector<2x128xf32>
    %32 = vector.extract_strided_slice %23 {offsets = [0, 128], sizes = [2, 128], strides = [1, 1]} : vector<2x384xf32> to vector<2x128xf32>
    %33 = vector.extract_strided_slice %22 {offsets = [0, 128], sizes = [2, 128], strides = [1, 1]} : vector<2x384xf32> to vector<2x128xf32>
    %34 = arith.addf %32, %33 : vector<2x128xf32>
    %35 = arith.negf %34 : vector<2x128xf32>
    %36 = math.exp %35 : vector<2x128xf32>
    %cst_27 = arith.constant 1.000000e+00 : f32
    %37 = vector.broadcast %cst_27 : f32 to vector<2x128xf32>
    %38 = arith.addf %37, %36 : vector<2x128xf32>
    %39 = arith.divf %37, %38 : vector<2x128xf32>
    %40 = vector.extract_strided_slice %23 {offsets = [0, 256], sizes = [2, 128], strides = [1, 1]} : vector<2x384xf32> to vector<2x128xf32>
    %41 = vector.extract_strided_slice %22 {offsets = [0, 256], sizes = [2, 128], strides = [1, 1]} : vector<2x384xf32> to vector<2x128xf32>
    %42 = vector.broadcast %18 : vector<1x128xf32> to vector<2x128xf32>
    %43 = arith.addf %41, %42 : vector<2x128xf32>
    %44 = arith.mulf %31, %43 : vector<2x128xf32>
    %45 = arith.addf %40, %44 : vector<2x128xf32>
    %46 = math.tanh %45 : vector<2x128xf32>
    %cst_28 = arith.constant 1.000000e+00 : f32
    %47 = vector.broadcast %cst_28 : f32 to vector<2x128xf32>
    %48 = arith.subf %47, %39 : vector<2x128xf32>
    %49 = arith.mulf %48, %46 : vector<2x128xf32>
    %50 = arith.mulf %39, %20 : vector<2x128xf32>
    %51 = arith.addf %49, %50 : vector<2x128xf32>
    %52 = arith.truncf %51 : vector<2x128xf32> to vector<2x128xbf16>
    %cst_29 = arith.constant dense<0.000000e+00> : vector<2x384xf32>
    %53 = tpu.matmul %52, %16, %cst_29 {dimension_numbers = #tpu.dot_dimension_numbers<[1], [0], [0], [1], [0, 0, 1, 1], [], []>} : vector<2x128xbf16>, vector<128x384xbf16>, vector<2x384xf32> -> vector<2x384xf32>
    %c2 = arith.constant 2 : index
    %c0_30 = arith.constant 0 : index
    %54 = vector.load %arg11[%c2, %c0_30] : memref<8x384xf32, #tpu.memory_space<vmem>>, vector<2x384xf32>
    %55 = vector.extract_strided_slice %54 {offsets = [0, 0], sizes = [2, 128], strides = [1, 1]} : vector<2x384xf32> to vector<2x128xf32>
    %56 = vector.extract_strided_slice %53 {offsets = [0, 0], sizes = [2, 128], strides = [1, 1]} : vector<2x384xf32> to vector<2x128xf32>
    %57 = arith.addf %55, %56 : vector<2x128xf32>
    %58 = arith.negf %57 : vector<2x128xf32>
    %59 = math.exp %58 : vector<2x128xf32>
    %cst_31 = arith.constant 1.000000e+00 : f32
    %60 = vector.broadcast %cst_31 : f32 to vector<2x128xf32>
    %61 = arith.addf %60, %59 : vector<2x128xf32>
    %62 = arith.divf %60, %61 : vector<2x128xf32>
    %63 = vector.extract_strided_slice %54 {offsets = [0, 128], sizes = [2, 128], strides = [1, 1]} : vector<2x384xf32> to vector<2x128xf32>
    %64 = vector.extract_strided_slice %53 {offsets = [0, 128], sizes = [2, 128], strides = [1, 1]} : vector<2x384xf32> to vector<2x128xf32>
    %65 = arith.addf %63, %64 : vector<2x128xf32>
    %66 = arith.negf %65 : vector<2x128xf32>
    %67 = math.exp %66 : vector<2x128xf32>
    %cst_32 = arith.constant 1.000000e+00 : f32
    %68 = vector.broadcast %cst_32 : f32 to vector<2x128xf32>
    %69 = arith.addf %68, %67 : vector<2x128xf32>
    %70 = arith.divf %68, %69 : vector<2x128xf32>
    %71 = vector.extract_strided_slice %54 {offsets = [0, 256], sizes = [2, 128], strides = [1, 1]} : vector<2x384xf32> to vector<2x128xf32>
    %72 = vector.extract_strided_slice %53 {offsets = [0, 256], sizes = [2, 128], strides = [1, 1]} : vector<2x384xf32> to vector<2x128xf32>
    %73 = vector.broadcast %18 : vector<1x128xf32> to vector<2x128xf32>
    %74 = arith.addf %72, %73 : vector<2x128xf32>
    %75 = arith.mulf %62, %74 : vector<2x128xf32>
    %76 = arith.addf %71, %75 : vector<2x128xf32>
    %77 = math.tanh %76 : vector<2x128xf32>
    %cst_33 = arith.constant 1.000000e+00 : f32
    %78 = vector.broadcast %cst_33 : f32 to vector<2x128xf32>
    %79 = arith.subf %78, %70 : vector<2x128xf32>
    %80 = arith.mulf %79, %77 : vector<2x128xf32>
    %81 = arith.mulf %70, %51 : vector<2x128xf32>
    %82 = arith.addf %80, %81 : vector<2x128xf32>
    %83 = arith.truncf %82 : vector<2x128xf32> to vector<2x128xbf16>
    %cst_34 = arith.constant dense<0.000000e+00> : vector<2x384xf32>
    %84 = tpu.matmul %83, %16, %cst_34 {dimension_numbers = #tpu.dot_dimension_numbers<[1], [0], [0], [1], [0, 0, 1, 1], [], []>} : vector<2x128xbf16>, vector<128x384xbf16>, vector<2x384xf32> -> vector<2x384xf32>
    %c4 = arith.constant 4 : index
    %c0_35 = arith.constant 0 : index
    %85 = vector.load %arg11[%c4, %c0_35] : memref<8x384xf32, #tpu.memory_space<vmem>>, vector<2x384xf32>
    %86 = vector.extract_strided_slice %85 {offsets = [0, 0], sizes = [2, 128], strides = [1, 1]} : vector<2x384xf32> to vector<2x128xf32>
    %87 = vector.extract_strided_slice %84 {offsets = [0, 0], sizes = [2, 128], strides = [1, 1]} : vector<2x384xf32> to vector<2x128xf32>
    %88 = arith.addf %86, %87 : vector<2x128xf32>
    %89 = arith.negf %88 : vector<2x128xf32>
    %90 = math.exp %89 : vector<2x128xf32>
    %cst_36 = arith.constant 1.000000e+00 : f32
    %91 = vector.broadcast %cst_36 : f32 to vector<2x128xf32>
    %92 = arith.addf %91, %90 : vector<2x128xf32>
    %93 = arith.divf %91, %92 : vector<2x128xf32>
    %94 = vector.extract_strided_slice %85 {offsets = [0, 128], sizes = [2, 128], strides = [1, 1]} : vector<2x384xf32> to vector<2x128xf32>
    %95 = vector.extract_strided_slice %84 {offsets = [0, 128], sizes = [2, 128], strides = [1, 1]} : vector<2x384xf32> to vector<2x128xf32>
    %96 = arith.addf %94, %95 : vector<2x128xf32>
    %97 = arith.negf %96 : vector<2x128xf32>
    %98 = math.exp %97 : vector<2x128xf32>
    %cst_37 = arith.constant 1.000000e+00 : f32
    %99 = vector.broadcast %cst_37 : f32 to vector<2x128xf32>
    %100 = arith.addf %99, %98 : vector<2x128xf32>
    %101 = arith.divf %99, %100 : vector<2x128xf32>
    %102 = vector.extract_strided_slice %85 {offsets = [0, 256], sizes = [2, 128], strides = [1, 1]} : vector<2x384xf32> to vector<2x128xf32>
    %103 = vector.extract_strided_slice %84 {offsets = [0, 256], sizes = [2, 128], strides = [1, 1]} : vector<2x384xf32> to vector<2x128xf32>
    %104 = vector.broadcast %18 : vector<1x128xf32> to vector<2x128xf32>
    %105 = arith.addf %103, %104 : vector<2x128xf32>
    %106 = arith.mulf %93, %105 : vector<2x128xf32>
    %107 = arith.addf %102, %106 : vector<2x128xf32>
    %108 = math.tanh %107 : vector<2x128xf32>
    %cst_38 = arith.constant 1.000000e+00 : f32
    %109 = vector.broadcast %cst_38 : f32 to vector<2x128xf32>
    %110 = arith.subf %109, %101 : vector<2x128xf32>
    %111 = arith.mulf %110, %108 : vector<2x128xf32>
    %112 = arith.mulf %101, %82 : vector<2x128xf32>
    %113 = arith.addf %111, %112 : vector<2x128xf32>
    %114 = arith.truncf %113 : vector<2x128xf32> to vector<2x128xbf16>
    %cst_39 = arith.constant dense<0.000000e+00> : vector<2x384xf32>
    %115 = tpu.matmul %114, %16, %cst_39 {dimension_numbers = #tpu.dot_dimension_numbers<[1], [0], [0], [1], [0, 0, 1, 1], [], []>} : vector<2x128xbf16>, vector<128x384xbf16>, vector<2x384xf32> -> vector<2x384xf32>
    %c6 = arith.constant 6 : index
    %c0_40 = arith.constant 0 : index
    %116 = vector.load %arg11[%c6, %c0_40] : memref<8x384xf32, #tpu.memory_space<vmem>>, vector<2x384xf32>
    %117 = vector.extract_strided_slice %116 {offsets = [0, 0], sizes = [2, 128], strides = [1, 1]} : vector<2x384xf32> to vector<2x128xf32>
    %118 = vector.extract_strided_slice %115 {offsets = [0, 0], sizes = [2, 128], strides = [1, 1]} : vector<2x384xf32> to vector<2x128xf32>
    %119 = arith.addf %117, %118 : vector<2x128xf32>
    %120 = arith.negf %119 : vector<2x128xf32>
    %121 = math.exp %120 : vector<2x128xf32>
    %cst_41 = arith.constant 1.000000e+00 : f32
    %122 = vector.broadcast %cst_41 : f32 to vector<2x128xf32>
    %123 = arith.addf %122, %121 : vector<2x128xf32>
    %124 = arith.divf %122, %123 : vector<2x128xf32>
    %125 = vector.extract_strided_slice %116 {offsets = [0, 128], sizes = [2, 128], strides = [1, 1]} : vector<2x384xf32> to vector<2x128xf32>
    %126 = vector.extract_strided_slice %115 {offsets = [0, 128], sizes = [2, 128], strides = [1, 1]} : vector<2x384xf32> to vector<2x128xf32>
    %127 = arith.addf %125, %126 : vector<2x128xf32>
    %128 = arith.negf %127 : vector<2x128xf32>
    %129 = math.exp %128 : vector<2x128xf32>
    %cst_42 = arith.constant 1.000000e+00 : f32
    %130 = vector.broadcast %cst_42 : f32 to vector<2x128xf32>
    %131 = arith.addf %130, %129 : vector<2x128xf32>
    %132 = arith.divf %130, %131 : vector<2x128xf32>
    %133 = vector.extract_strided_slice %116 {offsets = [0, 256], sizes = [2, 128], strides = [1, 1]} : vector<2x384xf32> to vector<2x128xf32>
    %134 = vector.extract_strided_slice %115 {offsets = [0, 256], sizes = [2, 128], strides = [1, 1]} : vector<2x384xf32> to vector<2x128xf32>
    %135 = vector.broadcast %18 : vector<1x128xf32> to vector<2x128xf32>
    %136 = arith.addf %134, %135 : vector<2x128xf32>
    %137 = arith.mulf %124, %136 : vector<2x128xf32>
    %138 = arith.addf %133, %137 : vector<2x128xf32>
    %139 = math.tanh %138 : vector<2x128xf32>
    %cst_43 = arith.constant 1.000000e+00 : f32
    %140 = vector.broadcast %cst_43 : f32 to vector<2x128xf32>
    %141 = arith.subf %140, %132 : vector<2x128xf32>
    %142 = arith.mulf %141, %139 : vector<2x128xf32>
    %143 = arith.mulf %132, %113 : vector<2x128xf32>
    %144 = arith.addf %142, %143 : vector<2x128xf32>
    %c0_44 = arith.constant 0 : index
    %c0_45 = arith.constant 0 : index
    %c0_46 = arith.constant 0 : index
    %145 = vector.load %arg9[%c0_44, %c0_45, %c0_46] : memref<2x2x128xf32, #tpu.memory_space<vmem>>, vector<1x2x128xf32>
    %146 = vector.shape_cast %145 : vector<1x2x128xf32> to vector<2x128xf32>
    %147 = vector.shape_cast %144 : vector<2x128xf32> to vector<1x2x128xf32>
    tpu.vector_store %arg9[%c0_44, %c0_45, %c0_46], %147 {strides = array<i32>} : memref<2x2x128xf32, #tpu.memory_space<vmem>>, vector<1x2x128xf32>,
    %148 = tpu.concatenate %51, %82, %113, %144 in 0 : vector<2x128xf32>, vector<2x128xf32>, vector<2x128xf32>, vector<2x128xf32> -> vector<8x128xf32>
    %c0_47 = arith.constant 0 : index
    %c0_48 = arith.constant 0 : index
    %149 = vector.load %arg10[%c0_47, %c0_48] : memref<8x128xf32, #tpu.memory_space<vmem>>, vector<8x128xf32>
    tpu.vector_store %arg10[%c0_47, %c0_48], %148 {strides = array<i32>} : memref<8x128xf32, #tpu.memory_space<vmem>>, vector<8x128xf32>,
    %c0_49 = arith.constant 0 : index
    %c0_50 = arith.constant 0 : index
    %150 = vector.load %arg10[%c0_49, %c0_50] : memref<8x128xf32, #tpu.memory_space<vmem>>, vector<8x128xf32>
    %151 = arith.truncf %150 : vector<8x128xf32> to vector<8x128xbf16>
    %c1 = arith.constant 1 : index
    %c0_51 = arith.constant 0 : index
    %c0_52 = arith.constant 0 : index
    %152 = vector.load %arg2[%c1, %c0_51, %c0_52] : memref<2x128x384xbf16, #tpu.memory_space<vmem>>, vector<1x128x384xbf16>
    %153 = vector.shape_cast %152 : vector<1x128x384xbf16> to vector<128x384xbf16>
    %cst_53 = arith.constant dense<0.000000e+00> : vector<8x384xf32>
    %154 = tpu.matmul %151, %153, %cst_53 {dimension_numbers = #tpu.dot_dimension_numbers<[1], [0], [0], [1], [0, 0, 1, 1], [], []>} : vector<8x128xbf16>, vector<128x384xbf16>, vector<8x384xf32> -> vector<8x384xf32>
    %c1_54 = arith.constant 1 : index
    %c0_55 = arith.constant 0 : index
    %c0_56 = arith.constant 0 : index
    %155 = vector.load %arg4[%c1_54, %c0_55, %c0_56] : memref<2x1x384xf32, #tpu.memory_space<vmem>>, vector<1x1x384xf32>
    %156 = vector.shape_cast %155 : vector<1x1x384xf32> to vector<1x384xf32>
    %157 = vector.broadcast %156 : vector<1x384xf32> to vector<8x384xf32>
    %158 = arith.addf %154, %157 : vector<8x384xf32>
    %c0_57 = arith.constant 0 : index
    %c0_58 = arith.constant 0 : index
    %159 = vector.load %arg11[%c0_57, %c0_58] : memref<8x384xf32, #tpu.memory_space<vmem>>, vector<8x384xf32>
    tpu.vector_store %arg11[%c0_57, %c0_58], %158 {strides = array<i32>} : memref<8x384xf32, #tpu.memory_space<vmem>>, vector<8x384xf32>,
    %c1_59 = arith.constant 1 : index
    %c0_60 = arith.constant 0 : index
    %c0_61 = arith.constant 0 : index
    %160 = vector.load %arg3[%c1_59, %c0_60, %c0_61] : memref<2x128x384xbf16, #tpu.memory_space<vmem>>, vector<1x128x384xbf16>
    %161 = vector.shape_cast %160 : vector<1x128x384xbf16> to vector<128x384xbf16>
    %c1_62 = arith.constant 1 : index
    %c0_63 = arith.constant 0 : index
    %c0_64 = arith.constant 0 : index
    %162 = vector.load %arg5[%c1_62, %c0_63, %c0_64] : memref<2x1x128xf32, #tpu.memory_space<vmem>>, vector<1x1x128xf32>
    %163 = vector.shape_cast %162 : vector<1x1x128xf32> to vector<1x128xf32>
    %c1_65 = arith.constant 1 : index
    %c0_66 = arith.constant 0 : index
    %c0_67 = arith.constant 0 : index
    %164 = vector.load %arg9[%c1_65, %c0_66, %c0_67] : memref<2x2x128xf32, #tpu.memory_space<vmem>>, vector<1x2x128xf32>
    %165 = vector.shape_cast %164 : vector<1x2x128xf32> to vector<2x128xf32>
    %166 = arith.truncf %165 : vector<2x128xf32> to vector<2x128xbf16>
    %cst_68 = arith.constant dense<0.000000e+00> : vector<2x384xf32>
    %167 = tpu.matmul %166, %161, %cst_68 {dimension_numbers = #tpu.dot_dimension_numbers<[1], [0], [0], [1], [0, 0, 1, 1], [], []>} : vector<2x128xbf16>, vector<128x384xbf16>, vector<2x384xf32> -> vector<2x384xf32>
    %c0_69 = arith.constant 0 : index
    %c0_70 = arith.constant 0 : index
    %168 = vector.load %arg11[%c0_69, %c0_70] : memref<8x384xf32, #tpu.memory_space<vmem>>, vector<2x384xf32>
    %169 = vector.extract_strided_slice %168 {offsets = [0, 0], sizes = [2, 128], strides = [1, 1]} : vector<2x384xf32> to vector<2x128xf32>
    %170 = vector.extract_strided_slice %167 {offsets = [0, 0], sizes = [2, 128], strides = [1, 1]} : vector<2x384xf32> to vector<2x128xf32>
    %171 = arith.addf %169, %170 : vector<2x128xf32>
    %172 = arith.negf %171 : vector<2x128xf32>
    %173 = math.exp %172 : vector<2x128xf32>
    %cst_71 = arith.constant 1.000000e+00 : f32
    %174 = vector.broadcast %cst_71 : f32 to vector<2x128xf32>
    %175 = arith.addf %174, %173 : vector<2x128xf32>
    %176 = arith.divf %174, %175 : vector<2x128xf32>
    %177 = vector.extract_strided_slice %168 {offsets = [0, 128], sizes = [2, 128], strides = [1, 1]} : vector<2x384xf32> to vector<2x128xf32>
    %178 = vector.extract_strided_slice %167 {offsets = [0, 128], sizes = [2, 128], strides = [1, 1]} : vector<2x384xf32> to vector<2x128xf32>
    %179 = arith.addf %177, %178 : vector<2x128xf32>
    %180 = arith.negf %179 : vector<2x128xf32>
    %181 = math.exp %180 : vector<2x128xf32>
    %cst_72 = arith.constant 1.000000e+00 : f32
    %182 = vector.broadcast %cst_72 : f32 to vector<2x128xf32>
    %183 = arith.addf %182, %181 : vector<2x128xf32>
    %184 = arith.divf %182, %183 : vector<2x128xf32>
    %185 = vector.extract_strided_slice %168 {offsets = [0, 256], sizes = [2, 128], strides = [1, 1]} : vector<2x384xf32> to vector<2x128xf32>
    %186 = vector.extract_strided_slice %167 {offsets = [0, 256], sizes = [2, 128], strides = [1, 1]} : vector<2x384xf32> to vector<2x128xf32>
    %187 = vector.broadcast %163 : vector<1x128xf32> to vector<2x128xf32>
    %188 = arith.addf %186, %187 : vector<2x128xf32>
    %189 = arith.mulf %176, %188 : vector<2x128xf32>
    %190 = arith.addf %185, %189 : vector<2x128xf32>
    %191 = math.tanh %190 : vector<2x128xf32>
    %cst_73 = arith.constant 1.000000e+00 : f32
    %192 = vector.broadcast %cst_73 : f32 to vector<2x128xf32>
    %193 = arith.subf %192, %184 : vector<2x128xf32>
    %194 = arith.mulf %193, %191 : vector<2x128xf32>
    %195 = arith.mulf %184, %165 : vector<2x128xf32>
    %196 = arith.addf %194, %195 : vector<2x128xf32>
    %197 = arith.truncf %196 : vector<2x128xf32> to vector<2x128xbf16>
    %cst_74 = arith.constant dense<0.000000e+00> : vector<2x384xf32>
    %198 = tpu.matmul %197, %161, %cst_74 {dimension_numbers = #tpu.dot_dimension_numbers<[1], [0], [0], [1], [0, 0, 1, 1], [], []>} : vector<2x128xbf16>, vector<128x384xbf16>, vector<2x384xf32> -> vector<2x384xf32>
    %c2_75 = arith.constant 2 : index
    %c0_76 = arith.constant 0 : index
    %199 = vector.load %arg11[%c2_75, %c0_76] : memref<8x384xf32, #tpu.memory_space<vmem>>, vector<2x384xf32>
    %200 = vector.extract_strided_slice %199 {offsets = [0, 0], sizes = [2, 128], strides = [1, 1]} : vector<2x384xf32> to vector<2x128xf32>
    %201 = vector.extract_strided_slice %198 {offsets = [0, 0], sizes = [2, 128], strides = [1, 1]} : vector<2x384xf32> to vector<2x128xf32>
    %202 = arith.addf %200, %201 : vector<2x128xf32>
    %203 = arith.negf %202 : vector<2x128xf32>
    %204 = math.exp %203 : vector<2x128xf32>
    %cst_77 = arith.constant 1.000000e+00 : f32
    %205 = vector.broadcast %cst_77 : f32 to vector<2x128xf32>
    %206 = arith.addf %205, %204 : vector<2x128xf32>
    %207 = arith.divf %205, %206 : vector<2x128xf32>
    %208 = vector.extract_strided_slice %199 {offsets = [0, 128], sizes = [2, 128], strides = [1, 1]} : vector<2x384xf32> to vector<2x128xf32>
    %209 = vector.extract_strided_slice %198 {offsets = [0, 128], sizes = [2, 128], strides = [1, 1]} : vector<2x384xf32> to vector<2x128xf32>
    %210 = arith.addf %208, %209 : vector<2x128xf32>
    %211 = arith.negf %210 : vector<2x128xf32>
    %212 = math.exp %211 : vector<2x128xf32>
    %cst_78 = arith.constant 1.000000e+00 : f32
    %213 = vector.broadcast %cst_78 : f32 to vector<2x128xf32>
    %214 = arith.addf %213, %212 : vector<2x128xf32>
    %215 = arith.divf %213, %214 : vector<2x128xf32>
    %216 = vector.extract_strided_slice %199 {offsets = [0, 256], sizes = [2, 128], strides = [1, 1]} : vector<2x384xf32> to vector<2x128xf32>
    %217 = vector.extract_strided_slice %198 {offsets = [0, 256], sizes = [2, 128], strides = [1, 1]} : vector<2x384xf32> to vector<2x128xf32>
    %218 = vector.broadcast %163 : vector<1x128xf32> to vector<2x128xf32>
    %219 = arith.addf %217, %218 : vector<2x128xf32>
    %220 = arith.mulf %207, %219 : vector<2x128xf32>
    %221 = arith.addf %216, %220 : vector<2x128xf32>
    %222 = math.tanh %221 : vector<2x128xf32>
    %cst_79 = arith.constant 1.000000e+00 : f32
    %223 = vector.broadcast %cst_79 : f32 to vector<2x128xf32>
    %224 = arith.subf %223, %215 : vector<2x128xf32>
    %225 = arith.mulf %224, %222 : vector<2x128xf32>
    %226 = arith.mulf %215, %196 : vector<2x128xf32>
    %227 = arith.addf %225, %226 : vector<2x128xf32>
    %228 = arith.truncf %227 : vector<2x128xf32> to vector<2x128xbf16>
    %cst_80 = arith.constant dense<0.000000e+00> : vector<2x384xf32>
    %229 = tpu.matmul %228, %161, %cst_80 {dimension_numbers = #tpu.dot_dimension_numbers<[1], [0], [0], [1], [0, 0, 1, 1], [], []>} : vector<2x128xbf16>, vector<128x384xbf16>, vector<2x384xf32> -> vector<2x384xf32>
    %c4_81 = arith.constant 4 : index
    %c0_82 = arith.constant 0 : index
    %230 = vector.load %arg11[%c4_81, %c0_82] : memref<8x384xf32, #tpu.memory_space<vmem>>, vector<2x384xf32>
    %231 = vector.extract_strided_slice %230 {offsets = [0, 0], sizes = [2, 128], strides = [1, 1]} : vector<2x384xf32> to vector<2x128xf32>
    %232 = vector.extract_strided_slice %229 {offsets = [0, 0], sizes = [2, 128], strides = [1, 1]} : vector<2x384xf32> to vector<2x128xf32>
    %233 = arith.addf %231, %232 : vector<2x128xf32>
    %234 = arith.negf %233 : vector<2x128xf32>
    %235 = math.exp %234 : vector<2x128xf32>
    %cst_83 = arith.constant 1.000000e+00 : f32
    %236 = vector.broadcast %cst_83 : f32 to vector<2x128xf32>
    %237 = arith.addf %236, %235 : vector<2x128xf32>
    %238 = arith.divf %236, %237 : vector<2x128xf32>
    %239 = vector.extract_strided_slice %230 {offsets = [0, 128], sizes = [2, 128], strides = [1, 1]} : vector<2x384xf32> to vector<2x128xf32>
    %240 = vector.extract_strided_slice %229 {offsets = [0, 128], sizes = [2, 128], strides = [1, 1]} : vector<2x384xf32> to vector<2x128xf32>
    %241 = arith.addf %239, %240 : vector<2x128xf32>
    %242 = arith.negf %241 : vector<2x128xf32>
    %243 = math.exp %242 : vector<2x128xf32>
    %cst_84 = arith.constant 1.000000e+00 : f32
    %244 = vector.broadcast %cst_84 : f32 to vector<2x128xf32>
    %245 = arith.addf %244, %243 : vector<2x128xf32>
    %246 = arith.divf %244, %245 : vector<2x128xf32>
    %247 = vector.extract_strided_slice %230 {offsets = [0, 256], sizes = [2, 128], strides = [1, 1]} : vector<2x384xf32> to vector<2x128xf32>
    %248 = vector.extract_strided_slice %229 {offsets = [0, 256], sizes = [2, 128], strides = [1, 1]} : vector<2x384xf32> to vector<2x128xf32>
    %249 = vector.broadcast %163 : vector<1x128xf32> to vector<2x128xf32>
    %250 = arith.addf %248, %249 : vector<2x128xf32>
    %251 = arith.mulf %238, %250 : vector<2x128xf32>
    %252 = arith.addf %247, %251 : vector<2x128xf32>
    %253 = math.tanh %252 : vector<2x128xf32>
    %cst_85 = arith.constant 1.000000e+00 : f32
    %254 = vector.broadcast %cst_85 : f32 to vector<2x128xf32>
    %255 = arith.subf %254, %246 : vector<2x128xf32>
    %256 = arith.mulf %255, %253 : vector<2x128xf32>
    %257 = arith.mulf %246, %227 : vector<2x128xf32>
    %258 = arith.addf %256, %257 : vector<2x128xf32>
    %259 = arith.truncf %258 : vector<2x128xf32> to vector<2x128xbf16>
    %cst_86 = arith.constant dense<0.000000e+00> : vector<2x384xf32>
    %260 = tpu.matmul %259, %161, %cst_86 {dimension_numbers = #tpu.dot_dimension_numbers<[1], [0], [0], [1], [0, 0, 1, 1], [], []>} : vector<2x128xbf16>, vector<128x384xbf16>, vector<2x384xf32> -> vector<2x384xf32>
    %c6_87 = arith.constant 6 : index
    %c0_88 = arith.constant 0 : index
    %261 = vector.load %arg11[%c6_87, %c0_88] : memref<8x384xf32, #tpu.memory_space<vmem>>, vector<2x384xf32>
    %262 = vector.extract_strided_slice %261 {offsets = [0, 0], sizes = [2, 128], strides = [1, 1]} : vector<2x384xf32> to vector<2x128xf32>
    %263 = vector.extract_strided_slice %260 {offsets = [0, 0], sizes = [2, 128], strides = [1, 1]} : vector<2x384xf32> to vector<2x128xf32>
    %264 = arith.addf %262, %263 : vector<2x128xf32>
    %265 = arith.negf %264 : vector<2x128xf32>
    %266 = math.exp %265 : vector<2x128xf32>
    %cst_89 = arith.constant 1.000000e+00 : f32
    %267 = vector.broadcast %cst_89 : f32 to vector<2x128xf32>
    %268 = arith.addf %267, %266 : vector<2x128xf32>
    %269 = arith.divf %267, %268 : vector<2x128xf32>
    %270 = vector.extract_strided_slice %261 {offsets = [0, 128], sizes = [2, 128], strides = [1, 1]} : vector<2x384xf32> to vector<2x128xf32>
    %271 = vector.extract_strided_slice %260 {offsets = [0, 128], sizes = [2, 128], strides = [1, 1]} : vector<2x384xf32> to vector<2x128xf32>
    %272 = arith.addf %270, %271 : vector<2x128xf32>
    %273 = arith.negf %272 : vector<2x128xf32>
    %274 = math.exp %273 : vector<2x128xf32>
    %cst_90 = arith.constant 1.000000e+00 : f32
    %275 = vector.broadcast %cst_90 : f32 to vector<2x128xf32>
    %276 = arith.addf %275, %274 : vector<2x128xf32>
    %277 = arith.divf %275, %276 : vector<2x128xf32>
    %278 = vector.extract_strided_slice %261 {offsets = [0, 256], sizes = [2, 128], strides = [1, 1]} : vector<2x384xf32> to vector<2x128xf32>
    %279 = vector.extract_strided_slice %260 {offsets = [0, 256], sizes = [2, 128], strides = [1, 1]} : vector<2x384xf32> to vector<2x128xf32>
    %280 = vector.broadcast %163 : vector<1x128xf32> to vector<2x128xf32>
    %281 = arith.addf %279, %280 : vector<2x128xf32>
    %282 = arith.mulf %269, %281 : vector<2x128xf32>
    %283 = arith.addf %278, %282 : vector<2x128xf32>
    %284 = math.tanh %283 : vector<2x128xf32>
    %cst_91 = arith.constant 1.000000e+00 : f32
    %285 = vector.broadcast %cst_91 : f32 to vector<2x128xf32>
    %286 = arith.subf %285, %277 : vector<2x128xf32>
    %287 = arith.mulf %286, %284 : vector<2x128xf32>
    %288 = arith.mulf %277, %258 : vector<2x128xf32>
    %289 = arith.addf %287, %288 : vector<2x128xf32>
    %c1_92 = arith.constant 1 : index
    %c0_93 = arith.constant 0 : index
    %c0_94 = arith.constant 0 : index
    %290 = vector.load %arg9[%c1_92, %c0_93, %c0_94] : memref<2x2x128xf32, #tpu.memory_space<vmem>>, vector<1x2x128xf32>
    %291 = vector.shape_cast %290 : vector<1x2x128xf32> to vector<2x128xf32>
    %292 = vector.shape_cast %289 : vector<2x128xf32> to vector<1x2x128xf32>
    tpu.vector_store %arg9[%c1_92, %c0_93, %c0_94], %292 {strides = array<i32>} : memref<2x2x128xf32, #tpu.memory_space<vmem>>, vector<1x2x128xf32>,
    %293 = tpu.concatenate %196, %227, %258, %289 in 0 : vector<2x128xf32>, vector<2x128xf32>, vector<2x128xf32>, vector<2x128xf32> -> vector<8x128xf32>
    %c0_95 = arith.constant 0 : index
    %c0_96 = arith.constant 0 : index
    %294 = vector.load %arg10[%c0_95, %c0_96] : memref<8x128xf32, #tpu.memory_space<vmem>>, vector<8x128xf32>
    tpu.vector_store %arg10[%c0_95, %c0_96], %293 {strides = array<i32>} : memref<8x128xf32, #tpu.memory_space<vmem>>, vector<8x128xf32>,
    %c0_97 = arith.constant 0 : index
    %c0_98 = arith.constant 0 : index
    %295 = vector.load %arg10[%c0_97, %c0_98] : memref<8x128xf32, #tpu.memory_space<vmem>>, vector<8x128xf32>
    %296 = arith.truncf %295 : vector<8x128xf32> to vector<8x128xbf16>
    %c0_99 = arith.constant 0 : index
    %c0_100 = arith.constant 0 : index
    %297 = vector.load %arg6[%c0_99, %c0_100] : memref<128x128xbf16, #tpu.memory_space<vmem>>, vector<128x128xbf16>
    %cst_101 = arith.constant dense<0.000000e+00> : vector<8x128xf32>
    %298 = tpu.matmul %296, %297, %cst_101 {dimension_numbers = #tpu.dot_dimension_numbers<[1], [0], [0], [1], [0, 0, 1, 1], [], []>} : vector<8x128xbf16>, vector<128x128xbf16>, vector<8x128xf32> -> vector<8x128xf32>
    %c0_102 = arith.constant 0 : index
    %c0_103 = arith.constant 0 : index
    %299 = vector.load %arg7[%c0_102, %c0_103] : memref<1x128xf32, #tpu.memory_space<vmem>>, vector<1x128xf32>
    %300 = vector.broadcast %299 : vector<1x128xf32> to vector<8x128xf32>
    %301 = arith.addf %298, %300 : vector<8x128xf32>
    %302 = arith.negf %301 : vector<8x128xf32>
    %303 = math.exp %302 : vector<8x128xf32>
    %cst_104 = arith.constant 1.000000e+00 : f32
    %304 = vector.broadcast %cst_104 : f32 to vector<8x128xf32>
    %305 = arith.addf %304, %303 : vector<8x128xf32>
    %306 = arith.divf %304, %305 : vector<8x128xf32>
    %c0_105 = arith.constant 0 : index
    %c0_106 = arith.constant 0 : index
    %307 = vector.load %arg8[%c0_105, %c0_106] : memref<8x128xf32, #tpu.memory_space<vmem>>, vector<8x128xf32>
    tpu.vector_store %arg8[%c0_105, %c0_106], %306 {strides = array<i32>} : memref<8x128xf32, #tpu.memory_space<vmem>>, vector<8x128xf32>,
    return
  }
  func.func @transform_0(%arg0: i32) -> (i32, i32) {
    %c0_i32 = arith.constant 0 : i32
    %c0_i32_0 = arith.constant 0 : i32
    return %arg0, %c0_i32 : i32, i32
  }
  func.func @transform_1(%arg0: i32) -> (i32, i32, i32) {
    %c0_i32 = arith.constant 0 : i32
    %c0_i32_0 = arith.constant 0 : i32
    %c0_i32_1 = arith.constant 0 : i32
    %c0_i32_2 = arith.constant 0 : i32
    return %c0_i32, %c0_i32_0, %c0_i32_1 : i32, i32, i32
  }
  func.func @transform_2(%arg0: i32) -> (i32, i32, i32) {
    %c0_i32 = arith.constant 0 : i32
    %c0_i32_0 = arith.constant 0 : i32
    %c0_i32_1 = arith.constant 0 : i32
    %c0_i32_2 = arith.constant 0 : i32
    return %c0_i32, %c0_i32_0, %c0_i32_1 : i32, i32, i32
  }
  func.func @transform_3(%arg0: i32) -> (i32, i32, i32) {
    %c0_i32 = arith.constant 0 : i32
    %c0_i32_0 = arith.constant 0 : i32
    %c0_i32_1 = arith.constant 0 : i32
    %c0_i32_2 = arith.constant 0 : i32
    return %c0_i32, %c0_i32_0, %c0_i32_1 : i32, i32, i32
  }
  func.func @transform_4(%arg0: i32) -> (i32, i32, i32) {
    %c0_i32 = arith.constant 0 : i32
    %c0_i32_0 = arith.constant 0 : i32
    %c0_i32_1 = arith.constant 0 : i32
    %c0_i32_2 = arith.constant 0 : i32
    return %c0_i32, %c0_i32_0, %c0_i32_1 : i32, i32, i32
  }
  func.func @transform_5(%arg0: i32) -> (i32, i32) {
    %c0_i32 = arith.constant 0 : i32
    %c0_i32_0 = arith.constant 0 : i32
    %c0_i32_1 = arith.constant 0 : i32
    return %c0_i32, %c0_i32_0 : i32, i32
  }
  func.func @transform_6(%arg0: i32) -> (i32, i32) {
    %c0_i32 = arith.constant 0 : i32
    %c0_i32_0 = arith.constant 0 : i32
    %c0_i32_1 = arith.constant 0 : i32
    return %c0_i32, %c0_i32_0 : i32, i32
  }
  func.func @transform_7(%arg0: i32) -> (i32, i32) {
    %c0_i32 = arith.constant 0 : i32
    %c0_i32_0 = arith.constant 0 : i32
    return %arg0, %c0_i32 : i32, i32
  }
}

</mosaic_0001>

<bundles_post_ra>
// kernel: nsnet_forward.1
= control target key start
LH: loop header
LB: loop body
LE: loop exit
PB: predicated region body
PF: predicated region fallthrough
CT: control target
= control target key end

     0   :  { %12 = vsyncpa [#allocation6], 0  ;;  %s3798_s0 = inlined_call_operand.vmem [shape: f32[16,128], index: 0, kind: input, shape index: {}]   ;;  %s3799_s1 = inlined_call_operand.hbm [shape: bf16[2,128,384], index: 1, kind: input, shape index: {}]   ;;  %s3800_s2 = inlined_call_operand.hbm [shape: bf16[2,128,384], index: 2, kind: input, shape index: {}]   ;;  %s3801_s3 = inlined_call_operand.vmem [shape: f32[2,1,384], index: 3, kind: input, shape index: {}]   ;;  %s3802_s4 = inlined_call_operand.vmem [shape: f32[2,1,128], index: 4, kind: input, shape index: {}]   ;;  %s3803_s5 = inlined_call_operand.vmem [shape: bf16[128,128], index: 5, kind: input, shape index: {}]   ;;  %s3804_s6 = inlined_call_operand.vmem [shape: f32[1,128], index: 6, kind: input, shape index: {}]   ;;  %s3805_s7 = inlined_call_operand.vmem [shape: f32[16,128], index: 7, kind: output, shape index: {}]  }
   0x1   :  { %13 = vsyncpa [#allocation8], 0  ;;  %s3162_s24 = smov 0  }
   0x2 LB: > { %s3168_s25 = sadd.s32 4294967295, %s3112_s24   ;;  %p2330_p0 = scmp.ge.s32.totalorder %s3112_s24, 1  ;;  %s3112_s24 = sphi %s3162_s24, %s19_s24  }
   0x3   : > { %p202_p1 = scmp.lt.s32.totalorder %s3112_s24, 3  ;;  %s3114_s26 = smov [#allocation5]  }
   0x4   : > { %s214_s27 = sshll.u32 %s3114_s26, 4  ;;  %p3806_p4 = scmp.eq.s32.totalorder %s3168_s25, 0  ;;  %s215_s27 = int_to_ptr.vmem [resolvable:$true] %s214_s27 }
   0x5   : > { %p3173_p3 = pnand %p2330_p0, %p202_p1  ;;  %s3115_s29 = smov [#allocation7]  }
   0x6   : > { %s227_s30 = sshll.u32 %s3115_s29, 4  ;;  %s3042_s11 = scalar_lea.hbm %s3799_s1, 6144  ;;  %s3186_s30 = int_to_ptr.vmem [resolvable:$true] %s227_s30 }
   0x7   : > { %s3808_s28 = scalar_select %p3173_p3, 1, 0 }
   0x8   : > { %p2795_p5 = pneg %p3173_p3  ;;  %p3043_p7 = scmp.ne.s32.totalorder %s3799_s1, %s3042_s11 }
   0x9   : > { %p3049_p11 = scmp.lt.u32.totalorder %s3042_s11, %s3799_s1 }
   0xa   : > { %p3182_p6 = pnand %p3806_p4, %p2795_p5 }
   0xc   : > { %p3044_p8 = pneg %p3182_p6 }
   0xe   : > { %p3045_p9 = pnand %p3044_p8, %p3043_p7 }
  0x10   : > { %p3046_p10 = pneg %p3045_p9 }
  0x12   : > { %p3051_p12 = pnand %p3049_p11, %p3046_p10 }
  0x14   : > { %3054 = shalt.err (!%p3051_p12)
}
  0x15   : > { %s3055_s16 = scalar_lea.vmem %s215_s27, 6144  ;;  %p3063_p5 = scmp.lt.s32.totalorder %s215_s27, %s215_s27 }
  0x16   : > { %p3056_p13 = scmp.ne.s32.totalorder %s215_s27, %s3055_s16  ;;  %p3064_p2 = scmp.lt.s32.totalorder %s3055_s16, %s3055_s16 }
  0x18   : > { %p3058_p0 = pnand %p3056_p13, %p3044_p8  ;;  %p3065_p4 = por %p3064_p2, %p3063_p5 }
  0x1a   : > { %p3059_p1 = pneg %p3058_p0 }
  0x1c   : > { %p3066_p3 = pnand %p3065_p4, %p3059_p1 }
  0x1e   : > { %3069 = shalt.err (!%p3066_p3)
}
  0x1f   : > { %s3116_s17 = smov 192   ;;  %s3117_s18 = smov 12  }
  0x20   : > { %2798 = dma.hbm_to_vmem [thread:$0]  (!%p3182_p6), %s3799_s1, 6144, %s215_s27, [#allocation6], %s3116_s17, %s3116_s17, %s3117_s18  }
  0x21   : > { %s3070_s23 = scalar_lea.hbm %s3800_s2, 6144 }
  0x22   : > { %p3071_p7 = scmp.ne.s32.totalorder %s3800_s2, %s3070_s23  ;;  %p3077_p4 = scmp.lt.u32.totalorder %s3070_s23, %s3800_s2 }
  0x24   : > { %p3073_p2 = pnand %p3071_p7, %p3044_p8 }
  0x26   : > { %p3074_p3 = pneg %p3073_p2 }
  0x28   : > { %p3079_p9 = pnand %p3077_p4, %p3074_p3 }
  0x2a   : > { %3082 = shalt.err (!%p3079_p9)
}
  0x2b   : > { %s3083_s27 = scalar_lea.vmem %s3186_s30, 6144  ;;  %p3091_p13 = scmp.lt.s32.totalorder %s3186_s30, %s3186_s30 }
  0x2c   : > { %p3084_p10 = scmp.ne.s32.totalorder %s3186_s30, %s3083_s27  ;;  %p3092_p0 = scmp.lt.s32.totalorder %s3083_s27, %s3083_s27 }
  0x2e   : > { %p3086_p11 = pnand %p3084_p10, %p3044_p8  ;;  %p3093_p1 = por %p3092_p0, %p3091_p13 }
  0x30   : > { %p3087_p12 = pneg %p3086_p11 }
  0x32   : > { %p3094_p5 = pnand %p3093_p1, %p3087_p12 }
  0x34   : > { %3097 = shalt.err (!%p3094_p5)
}
  0x35   : > { %2801 = dma.hbm_to_vmem [thread:$0]  (!%p3182_p6), %s3800_s2, 6144, %s3186_s30, [#allocation8], %s3116_s17, %s3116_s17, %s3117_s18  }
  0x36   : > { %p3810_p7 = scmp.ne.s32.totalorder %s3808_s28, 0 }
  0x37   : > { %p3811_p2 = scmp.eq.s32.totalorder (!%p3810_p7), %s3168_s25, 0 }
  0x38   : > { %262 = sbr.rel (%p3810_p7) target bundleno = 2526 (0x9de), region = 48 }
  0x3f   : > { %3103 = dma.done.wait (%p3811_p2), [#allocation6], 6144   ;;  %p3812_p8 = pmov %p3811_p2 }
  0x40   : > { %p3813_p3 = pmov %p3811_p2 }
  0x41   : > { %3105 = vsyncadd (%p3812_p8), [#allocation6], 4294961152 }
  0x42   : > { %3107 = dma.done.wait (%p3813_p3), [#allocation8], 6144   ;;  %p3814_p4 = pmov %p3811_p2 }
  0x43   : > { %p296_p9 = scmp.lt.s32.totalorder %s3168_s25, 1  ;;  %p3815_p6 = scmp.ne.s32.totalorder %s3168_s25, 0 }
  0x44   : > { %3109 = vsyncadd (%p3814_p4), [#allocation8], 4294961152  ;;  %v3118_v0 = vmov (!%p3815_p6), 0.0  }
  0x45   : > { %s297_s8 = scalar_select %p296_p9, %s3168_s25, 1 }
  0x46   : > { %308 = sbr.rel (%p3815_p6) target bundleno = 77 (0x4d), region = 60  ;;  %309 = vst [vmem:[#allocation2] sm:$0x3] (!%p3815_p6), %v3118_v0  ;;  %310 = vst [vmem:[#allocation2 + $0x2] sm:$0x3] (!%p3815_p6), %v3118_v0 }
  0x47   : > { %s2337_s30 = sshll.u32 %s297_s8, 3 }
  0x48   : > { %s3250_s14 = scalar_lea.vmem %s3798_s0, %s2337_s30  ;;  %s3255_s17 = scalar_lea.vmem %s3805_s7, %s2337_s30 }
  0x4d PF: > { %v2822_v1 = vld [vmem:[#allocation5 + $0x4] ss:$12 sps:$4 sm:$0xff]   ;;  %v2824_v2 = vld [vmem:[#allocation5] ss:$12 sps:$4 sm:$0xff]   ;;  %v3119_v3 = vmov 0.0   ;;  %v3120_v4 = vmov 0   ;;  %v349_v55 = vlaneseq }
  0x4e   : > { %2567 = vmatprep.subr.bf16.mxu1 %v3119_v3  ;;  %524 = vmatprep.mubr.bf16.mxu0 %v3120_v4  ;;  %v2825_v5 = vld [vmem:[#allocation5 + $0x1c] ss:$12 sps:$4 sm:$0xff]   ;;  %vm3121_vm0 = vmmov 0   ;;  %v2827_v6 = vld [vmem:[#allocation5 + $0x18] ss:$12 sps:$4 sm:$0xff]   ;;  %vm1215_vm1 = vcmask 1041408  }
  0x4f   : > { %492 = vmatprep.subr.bf16.mxu0 %v2822_v1  ;;  %2583 = vmatprep.mubr.msk.bf16.mxu1 %vm3121_vm0, %v3119_v3  ;;  %v2828_v7 = vld [vmem:[#allocation5 + $0x34] ss:$12 sps:$4 sm:$0xff]   ;;  %v2830_v8 = vld [vmem:[#allocation5 + $0x30] ss:$12 sps:$4 sm:$0xff]   ;;  %v2831_v9 = vld [vmem:[#allocation5 + $0x4c] ss:$12 sps:$4 sm:$0xff]  }
  0x50   : > { %493 = vmatpush1.bf16.msra.mxu0 %v2824_v2  ;;  %v2842_v10 = vld [vmem:[#allocation5 + $0x8] ss:$12 sps:$4 sm:$0xff]   ;;  %v2834_v12 = vld [vmem:[#allocation5 + $0x64] ss:$12 sps:$4 sm:$0xff]   ;;  %v2846_v13 = vld [vmem:[#allocation5 + $0x20] ss:$12 sps:$4 sm:$0xff]  }
  0x51   : > { %494 = vmatprep.subr.bf16.mxu0 %v2825_v5  ;;  %v2833_v11 = vld [vmem:[#allocation5 + $0x48] ss:$12 sps:$4 sm:$0xff]   ;;  %2568 = vmatpush3.bf16.msra.mxu1 %v2842_v10  ;;  %v2836_v14 = vld [vmem:[#allocation5 + $0x60] ss:$12 sps:$4 sm:$0xff]   ;;  %v2848_v15 = vld [vmem:[#allocation5 + $0x38] ss:$12 sps:$4 sm:$0xff]  }
  0x52   : > { %2569 = vmatprep.subr.bf16.mxu1 %v3119_v3  ;;  %v2837_v16 = vld [vmem:[#allocation5 + $0x7c] ss:$12 sps:$4 sm:$0xff]   ;;  %v2839_v17 = vld [vmem:[#allocation5 + $0x78] ss:$12 sps:$4 sm:$0xff]   ;;  %v2840_v19 = vld [vmem:[#allocation5 + $0x94] ss:$12 sps:$4 sm:$0xff]  }
  0x53   : > { %v2852_v18 = vld [vmem:[#allocation5 + $0x50] ss:$12 sps:$4 sm:$0xff]   ;;  %v2856_v21 = vld [vmem:[#allocation5 + $0x68] ss:$12 sps:$4 sm:$0xff]   ;;  %v2844_v22 = vld [vmem:[#allocation5 + $0xac] ss:$12 sps:$4 sm:$0xff]  }
  0x54   : > { %495 = vmatpush1.bf16.msra.mxu0 %v2827_v6  ;;  %v2843_v20 = vld [vmem:[#allocation5 + $0x90] ss:$12 sps:$4 sm:$0xff]   ;;  %v2847_v23 = vld [vmem:[#allocation5 + $0xa8] ss:$12 sps:$4 sm:$0xff]   ;;  %v2860_v25 = vld [vmem:[#allocation5 + $0x80] ss:$12 sps:$4 sm:$0xff]  }
  0x55   : > { %496 = vmatprep.subr.bf16.mxu0 %v2828_v7  ;;  %2570 = vmatpush3.bf16.msra.mxu1 %v2846_v13  ;;  %v311_v24 = vld [vmem:[%s3250_s14] sm:$0xff]  ;;  %v3271_v28 = vld [vmem:[#allocation7] ss:$12 sps:$4 sm:$0xff]   ;;  %v2868_v32 = vld [vmem:[#allocation5 + $0xb0] ss:$12 sps:$4 sm:$0xff]   ;;  %v3395_v56 = vshrl.u32 %v349_v55, 7 }
  0x56   : > { %2571 = vmatprep.subr.bf16.mxu1 %v3119_v3  ;;  %v3268_v26 = vld [vmem:[#allocation7 + $0x4] ss:$12 sps:$4 sm:$0xff]   ;;  %v314_v27 = vpack.c.bf16 %v311_v24, %v311_v24  ;;  %v3274_v30 = vld [vmem:[#allocation7 + $0x1c] ss:$12 sps:$4 sm:$0xff]   ;;  %v3281_v33 = vld [vmem:[#allocation7 + $0x34] ss:$12 sps:$4 sm:$0xff]  }
  0x57   : > { %v2864_v29 = vld [vmem:[#allocation5 + $0x98] ss:$12 sps:$4 sm:$0xff]   ;;  %v3284_v34 = vld [vmem:[#allocation7 + $0x30] ss:$12 sps:$4 sm:$0xff]   ;;  %v3289_v36 = vld [vmem:[#allocation7 + $0x8] ss:$12 sps:$4 sm:$0xff]  }
  0x58   : > { %497 = vmatpush1.bf16.msra.mxu0 %v2830_v8  ;;  %v3277_v31 = vld [vmem:[#allocation7 + $0x18] ss:$12 sps:$4 sm:$0xff]   ;;  %v3294_v37 = vld [vmem:[#allocation7 + $0x48] ss:$12 sps:$4 sm:$0xff]   ;;  %v3296_v38 = vld [vmem:[#allocation7 + $0x20] ss:$12 sps:$4 sm:$0xff]  }
  0x59   : > { %498 = vmatprep.subr.bf16.mxu0 %v2831_v9  ;;  %2572 = vmatpush3.bf16.msra.mxu1 %v2848_v15  ;;  %v3287_v35 = vld [vmem:[#allocation7 + $0x4c] ss:$12 sps:$4 sm:$0xff]   ;;  %v3298_v39 = vld [vmem:[#allocation7 + $0x64] ss:$12 sps:$4 sm:$0xff]   ;;  %v3310_v42 = vld [vmem:[#allocation7 + $0x7c] ss:$12 sps:$4 sm:$0xff]  }
  0x5a   : > { %2573 = vmatprep.subr.bf16.mxu1 %v3119_v3  ;;  %v3304_v40 = vld [vmem:[#allocation7 + $0x60] ss:$12 sps:$4 sm:$0xff]   ;;  %v3306_v41 = vld [vmem:[#allocation7 + $0x38] ss:$12 sps:$4 sm:$0xff]   ;;  %v3318_v44 = vld [vmem:[#allocation7 + $0x50] ss:$12 sps:$4 sm:$0xff]  }
  0x5b   : > { %v3316_v43 = vld [vmem:[#allocation7 + $0x78] ss:$12 sps:$4 sm:$0xff]   ;;  %v3320_v45 = vld [vmem:[#allocation7 + $0x94] ss:$12 sps:$4 sm:$0xff]   ;;  %v3326_v46 = vld [vmem:[#allocation7 + $0x90] ss:$12 sps:$4 sm:$0xff]  }
  0x5c   : > { %499 = vmatpush1.bf16.msra.mxu0 %v2833_v11  ;;  %v3328_v47 = vld [vmem:[#allocation7 + $0x68] ss:$12 sps:$4 sm:$0xff]   ;;  %v3330_v48 = vld [vmem:[#allocation7 + $0xac] ss:$12 sps:$4 sm:$0xff]   ;;  %v3338_v50 = vld [vmem:[#allocation2] sm:$0x3] }
  0x5d   : > { %500 = vmatprep.subr.bf16.mxu0 %v2834_v12  ;;  %2574 = vmatpush3.bf16.msra.mxu1 %v2852_v18  ;;  %v3336_v49 = vld [vmem:[#allocation7 + $0xa8] ss:$12 sps:$4 sm:$0xff]   ;;  %v3340_v51 = vld [vmem:[#allocation7 + $0x80] ss:$12 sps:$4 sm:$0xff]   ;;  %v3346_v52 = vld [vmem:[#allocation7 + $0x98] ss:$12 sps:$4 sm:$0xff]   ;;  %v610_v53 = vpack.c.bf16 %v3338_v50, %v3338_v50 }
  0x5e   : > { %2575 = vmatprep.subr.bf16.mxu1 %v3119_v3  ;;  %v3355_v54 = vld [vmem:[#allocation7 + $0xb0] ss:$12 sps:$4 sm:$0xff]   ;;  %v351_v57 = vsub.s32 0, %v3395_v56  ;;  %v347_v58 = vld [vmem:[%s3801_s3] sm:$0x7]  ;;  %v355_v59 = vsub.s32 1, %v3395_v56 }
  0x5f   : > { %v359_v1 = vsub.s32 2, %v3395_v56  ;;  %v3412_v55 = vld [vmem:[%s3802_s4] ss:$0 sm:$0xff]  ;;  %vm1217_vm2 = vcmask 1043456   ;;  %vm1219_vm3 = vcmask 1045504  }
  0x60   : > { %501 = vmatpush1.bf16.msra.mxu0 %v2836_v14  ;;  %v352_v60 = vrot.slane %v347_v58, %v351_v57  ;;  %v356_v61 = vrot.slane %v347_v58, %v355_v59 }
  0x61   : > { %502 = vmatprep.subr.bf16.mxu0 %v2837_v16  ;;  %2576 = vmatpush3.bf16.msra.mxu1 %v2856_v21  ;;  %v360_v7 = vrot.slane %v347_v58, %v359_v1 }
  0x62   : > { %2577 = vmatprep.subr.bf16.mxu1 %v3119_v3 }
  0x64   : > { %503 = vmatpush1.bf16.msra.mxu0 %v2839_v17 }
  0x65   : > { %504 = vmatprep.subr.bf16.mxu0 %v2840_v19  ;;  %2578 = vmatpush3.bf16.msra.mxu1 %v2860_v25 }
  0x66   : > { %2579 = vmatprep.subr.bf16.mxu1 %v3119_v3 }
  0x68   : > { %505 = vmatpush1.bf16.msra.mxu0 %v2843_v20 }
  0x69   : > { %506 = vmatprep.subr.bf16.mxu0 %v2844_v22  ;;  %2580 = vmatpush3.bf16.msra.mxu1 %v2864_v29 }
  0x6a   : > { %2581 = vmatprep.subr.bf16.mxu1 %v3119_v3 }
  0x6c   : > { %507 = vmatpush1.bf16.msra.mxu0 %v2847_v23 }
  0x6d   : > { %739 = vmatprep.subr.bf16.mxu0 %v3268_v26  ;;  %2582 = vmatpush3.bf16.msra.mxu1 %v2868_v32 }
  0x6e   : > { %2587 = vmatprep.subr.bf16.mxu1 %v3119_v3 }
  0x6f   : > { %525 = vmatmul.mubr.bf16.vlgmr.msra.gmra.mrb[0].mxu0 %v314_v27 }
  0x70   : > { %740 = vmatpush1.bf16.msra.mxu0 %v3271_v28  ;;  %771 = vmatprep.mubr.bf16.mxu0 %v3120_v4 }
  0x71   : > { %741 = vmatprep.subr.bf16.mxu0 %v3274_v30  ;;  %2584 = vmatmul.mubr.bf16.vlgmr.msra.gmra.mrb[0].mxu1 %v314_v27 }
  0x72   : > { %2588 = vmatpush3.bf16.msra.mxu1 %v3289_v36  ;;  %2603 = vmatprep.mubr.msk.bf16.mxu1 %vm3121_vm0, %v3119_v3 }
  0x73   : > { %2589 = vmatprep.subr.bf16.mxu1 %v3119_v3 }
  0x74   : > { %742 = vmatpush1.bf16.msra.mxu0 %v3277_v31 }
  0x75   : > { %743 = vmatprep.subr.bf16.mxu0 %v3281_v33 }
  0x76   : > { %2590 = vmatpush3.bf16.msra.mxu1 %v3296_v38 }
  0x77   : > { %2591 = vmatprep.subr.bf16.mxu1 %v3119_v3 }
  0x78   : > { %744 = vmatpush1.bf16.msra.mxu0 %v3284_v34 }
  0x79   : > { %745 = vmatprep.subr.bf16.mxu0 %v3287_v35 }
  0x7a   : > { %2592 = vmatpush3.bf16.msra.mxu1 %v3306_v41 }
  0x7b   : > { %2593 = vmatprep.subr.bf16.mxu1 %v3119_v3 }
  0x7c   : > { %746 = vmatpush1.bf16.msra.mxu0 %v3294_v37 }
  0x7d   : > { %747 = vmatprep.subr.bf16.mxu0 %v3298_v39 }
  0x7e   : > { %2594 = vmatpush3.bf16.msra.mxu1 %v3318_v44 }
  0x7f   : > { %2595 = vmatprep.subr.bf16.mxu1 %v3119_v3 }
  0x80   : > { %748 = vmatpush1.bf16.msra.mxu0 %v3304_v40 }
  0x81   : > { %749 = vmatprep.subr.bf16.mxu0 %v3310_v42 }
  0x82   : > { %2596 = vmatpush3.bf16.msra.mxu1 %v3328_v47 }
  0x83   : > { %2597 = vmatprep.subr.bf16.mxu1 %v3119_v3 }
  0x84   : > { %750 = vmatpush1.bf16.msra.mxu0 %v3316_v43 }
  0x85   : > { %751 = vmatprep.subr.bf16.mxu0 %v3320_v45 }
  0x86   : > { %2598 = vmatpush3.bf16.msra.mxu1 %v3340_v51 }
  0x87   : > { %2599 = vmatprep.subr.bf16.mxu1 %v3119_v3 }
  0x88   : > { %752 = vmatpush1.bf16.msra.mxu0 %v3326_v46 }
  0x89   : > { %753 = vmatprep.subr.bf16.mxu0 %v3330_v48 }
  0x8a   : > { %2600 = vmatpush3.bf16.msra.mxu1 %v3346_v52 }
  0x8b   : > { %2601 = vmatprep.subr.bf16.mxu1 %v3119_v3 }
  0x8c   : > { %754 = vmatpush1.bf16.msra.mxu0 %v3336_v49 }
  0x8d   : > { %852 = vmatprep.subr.bf16.mxu0 %v3268_v26 }
  0x8e   : > { %2602 = vmatpush3.bf16.msra.mxu1 %v3355_v54 }
  0x8f   : > { %772 = vmatmul.mubr.bf16.vlgmr.msra.gmra.mrb[4].mxu0 %v610_v53  ;;  %2607 = vmatprep.subr.bf16.mxu1 %v3119_v3 }
  0x90   : > { %853 = vmatpush1.bf16.msra.mxu0 %v3271_v28  ;;  %884 = vmatprep.mubr.bf16.mxu0 %v3120_v4 }
  0x91   : > { %854 = vmatprep.subr.bf16.mxu0 %v3274_v30  ;;  %2604 = vmatmul.mubr.bf16.vlgmr.msra.gmra.mrb[4].mxu1 %v610_v53 }
  0x92   : > { %2608 = vmatpush3.bf16.msra.mxu1 %v3289_v36  ;;  %2623 = vmatprep.mubr.msk.bf16.mxu1 %vm3121_vm0, %v3119_v3 }
  0x93   : > { %2609 = vmatprep.subr.bf16.mxu1 %v3119_v3 }
  0x94   : > { %855 = vmatpush1.bf16.msra.mxu0 %v3277_v31 }
  0x95   : > { %856 = vmatprep.subr.bf16.mxu0 %v3281_v33 }
  0x96   : > { %2610 = vmatpush3.bf16.msra.mxu1 %v3296_v38 }
  0x97   : > { %2611 = vmatprep.subr.bf16.mxu1 %v3119_v3 }
  0x98   : > { %857 = vmatpush1.bf16.msra.mxu0 %v3284_v34 }
  0x99   : > { %858 = vmatprep.subr.bf16.mxu0 %v3287_v35 }
  0x9a   : > { %2612 = vmatpush3.bf16.msra.mxu1 %v3306_v41 }
  0x9b   : > { %2613 = vmatprep.subr.bf16.mxu1 %v3119_v3 }
  0x9c   : > { %859 = vmatpush1.bf16.msra.mxu0 %v3294_v37 }
  0x9d   : > { %860 = vmatprep.subr.bf16.mxu0 %v3298_v39 }
  0x9e   : > { %2614 = vmatpush3.bf16.msra.mxu1 %v3318_v44 }
  0x9f   : > { %2615 = vmatprep.subr.bf16.mxu1 %v3119_v3 }
  0xa0   : > { %861 = vmatpush1.bf16.msra.mxu0 %v3304_v40 }
  0xa1   : > { %862 = vmatprep.subr.bf16.mxu0 %v3310_v42 }
  0xa2   : > { %2616 = vmatpush3.bf16.msra.mxu1 %v3328_v47 }
  0xa3   : > { %2617 = vmatprep.subr.bf16.mxu1 %v3119_v3 }
  0xa4   : > { %863 = vmatpush1.bf16.msra.mxu0 %v3316_v43 }
  0xa5   : > { %864 = vmatprep.subr.bf16.mxu0 %v3320_v45 }
  0xa6   : > { %2618 = vmatpush3.bf16.msra.mxu1 %v3340_v51 }
  0xa7   : > { %2619 = vmatprep.subr.bf16.mxu1 %v3119_v3 }
  0xa8   : > { %865 = vmatpush1.bf16.msra.mxu0 %v3326_v46 }
  0xa9   : > { %866 = vmatprep.subr.bf16.mxu0 %v3330_v48 }
  0xaa   : > { %2620 = vmatpush3.bf16.msra.mxu1 %v3346_v52 }
  0xab   : > { %2621 = vmatprep.subr.bf16.mxu1 %v3119_v3 }
  0xac   : > { %867 = vmatpush1.bf16.msra.mxu0 %v3336_v49 }
  0xad   : > { %974 = vmatprep.subr.bf16.mxu0 %v3268_v26 }
  0xae   : > { %2622 = vmatpush3.bf16.msra.mxu1 %v3355_v54 }
  0xaf   : > { %2627 = vmatprep.subr.bf16.mxu1 %v3119_v3 }
 0x142   : > { %v526_v62 = vpop.f32.mrb[0].mxu0 }
 0x143   : > { %v527_v63 = vadd.f32 %v526_v62, %v352_v60  ;;  %v528_v0 = vpop.f32.mrb[1].mxu0 }
 0x144   : > { %v529_v2 = vadd.f32 %v528_v0, %v356_v61  ;;  %v530_v5 = vpop.f32.mrb[2].mxu0  ;;  %v567_v8 = vpop.f32.mrb[0].mxu1 }
 0x145   : > { %573 = vst [vmem:[#allocation4] sm:$0xff] %v527_v63  ;;  %v531_v6 = vpop.f32.mrb[3].mxu0  ;;  %v568_v9 = vadd.f32 %v567_v8, %v360_v7  ;;  %v2585_v10 = vpop.f32.mrb[1].mxu1 }
 0x146   : > { %574 = vst [vmem:[#allocation4 + $0x8] sm:$0xff] %v529_v2  ;;  %v570_v11 = vpop.f32.mrb[2].mxu1 }
 0x147   : > { %575 = vst [vmem:[#allocation4 + $0x10] sm:$0xff] %v568_v9  ;;  %v2586_v12 = vpop.f32.mrb[3].mxu1 }
 0x14c   : > { %v820_v14 = vld [vmem:[#allocation4] sm:$0x3] }
 0x14d   : > { %v821_v19 = vld [vmem:[#allocation4 + $0x8] sm:$0x3] }
 0x14e   : > { %v822_v63 = vld [vmem:[#allocation4 + $0x10] sm:$0x3] }
 0x162   : > { %v773_v13 = vpop.f32.mrb[4].mxu0 }
 0x163   : > { %v823_v15 = vadd.f32 %v820_v14, %v773_v13  ;;  %v775_v16 = vpop.f32.mrb[5].mxu0 }
 0x164   : > { %v777_v17 = vpop.f32.mrb[6].mxu0  ;;  %v830_v21 = vadd.f32 %v821_v19, %v775_v16  ;;  %v814_v23 = vpop.f32.mrb[4].mxu1 }
 0x165   : > { %v2388_v18 = vmul.f32 -1.442695, %v823_v15  ;;  %v778_v20 = vpop.f32.mrb[7].mxu0  ;;  %v2605_v24 = vpop.f32.mrb[5].mxu1  ;;  %v843_v60 = vadd.f32 %v3412_v55, %v814_v23  ;;  %v933_v15 = vld [vmem:[#allocation4] sm:$0xc] }
 0x166   : > { %v2389_v22 = vmul.f32 -1.442695, %v830_v21  ;;  %v817_v25 = vpop.f32.mrb[6].mxu1  ;;  %v934_v23 = vld [vmem:[#allocation4 + $0x8] sm:$0xc] }
 0x167   : > { %2958 = vpow2.f32 %v2388_v18  ;;  %v2606_v27 = vpop.f32.mrb[7].mxu1 }
 0x168   : > { %2960 = vpow2.f32 %v2389_v22 }
 0x171   : > { %v2959_v29 = vpop.eup %2958 }
 0x172   : > { %v827_v32 = vadd.f32 1.0, %v2959_v29  ;;  %v2961_v53 = vpop.eup %2960 }
 0x173   : > { %v834_v58 = vadd.f32 1.0, %v2961_v53 }
 0x174   : > { %2962 = vrcp.f32 %v827_v32 }
 0x175   : > { %2964 = vrcp.f32 %v834_v58 }
 0x17e   : > { %v2963_v61 = vpop.eup %2962 }
 0x17f   : > { %v844_v62 = vmul.f32 %v2963_v61, %v843_v60  ;;  %v2965_v2 = vpop.eup %2964 }
 0x180   : > { %v847_v5 = vsub.f32 1.0, %v2965_v2  ;;  %v849_v8 = vmul.f32 %v2965_v2, %v3338_v50 }
 0x181   : > { %v845_v0 = vadd.f32 %v844_v62, %v822_v63  ;;  %v935_v62 = vld [vmem:[#allocation4 + $0x10] sm:$0xc] }
 0x183   : > { %2966 = vtanh.f32 %v845_v0 }
 0x18d   : > { %v2967_v6 = vpop.eup %2966 }
 0x18e   : > { %v848_v7 = vmul.f32 %v2967_v6, %v847_v5 }
 0x190   : > { %v3416_v9 = vadd.f32 %v849_v8, %v848_v7 }
 0x192   : > { %v851_v10 = vpack.c.bf16 %v3416_v9, %v3416_v9  ;;  %v966_v5 = vrot.slane %v3416_v9, 6 }
 0x194   : > { %885 = vmatmul.mubr.bf16.vlgmr.msra.gmra.mrb[8].mxu0 %v851_v10  ;;  %2624 = vmatmul.mubr.bf16.vlgmr.msra.gmra.mrb[8].mxu1 %v851_v10 }
 0x195   : > { %975 = vmatpush1.bf16.msra.mxu0 %v3271_v28  ;;  %2628 = vmatpush3.bf16.msra.mxu1 %v3289_v36 }
 0x196   : > { %976 = vmatprep.subr.bf16.mxu0 %v3274_v30  ;;  %2629 = vmatprep.subr.bf16.mxu1 %v3119_v3 }
 0x197   : > { %1006 = vmatprep.mubr.bf16.mxu0 %v3120_v4  ;;  %2643 = vmatprep.mubr.msk.bf16.mxu1 %vm3121_vm0, %v3119_v3 }
 0x199   : > { %977 = vmatpush1.bf16.msra.mxu0 %v3277_v31  ;;  %2630 = vmatpush3.bf16.msra.mxu1 %v3296_v38 }
 0x19a   : > { %978 = vmatprep.subr.bf16.mxu0 %v3281_v33  ;;  %2631 = vmatprep.subr.bf16.mxu1 %v3119_v3 }
 0x19d   : > { %979 = vmatpush1.bf16.msra.mxu0 %v3284_v34  ;;  %2632 = vmatpush3.bf16.msra.mxu1 %v3306_v41 }
 0x19e   : > { %980 = vmatprep.subr.bf16.mxu0 %v3287_v35  ;;  %2633 = vmatprep.subr.bf16.mxu1 %v3119_v3 }
 0x1a1   : > { %981 = vmatpush1.bf16.msra.mxu0 %v3294_v37  ;;  %2634 = vmatpush3.bf16.msra.mxu1 %v3318_v44 }
 0x1a2   : > { %982 = vmatprep.subr.bf16.mxu0 %v3298_v39  ;;  %2635 = vmatprep.subr.bf16.mxu1 %v3119_v3 }
 0x1a5   : > { %983 = vmatpush1.bf16.msra.mxu0 %v3304_v40  ;;  %2636 = vmatpush3.bf16.msra.mxu1 %v3328_v47 }
 0x1a6   : > { %984 = vmatprep.subr.bf16.mxu0 %v3310_v42  ;;  %2637 = vmatprep.subr.bf16.mxu1 %v3119_v3 }
 0x1a9   : > { %985 = vmatpush1.bf16.msra.mxu0 %v3316_v43  ;;  %2638 = vmatpush3.bf16.msra.mxu1 %v3340_v51 }
 0x1aa   : > { %986 = vmatprep.subr.bf16.mxu0 %v3320_v45  ;;  %2639 = vmatprep.subr.bf16.mxu1 %v3119_v3 }
 0x1ad   : > { %987 = vmatpush1.bf16.msra.mxu0 %v3326_v46  ;;  %2640 = vmatpush3.bf16.msra.mxu1 %v3346_v52 }
 0x1ae   : > { %988 = vmatprep.subr.bf16.mxu0 %v3330_v48  ;;  %2641 = vmatprep.subr.bf16.mxu1 %v3119_v3 }
 0x1b1   : > { %989 = vmatpush1.bf16.msra.mxu0 %v3336_v49  ;;  %2642 = vmatpush3.bf16.msra.mxu1 %v3355_v54 }
 0x1b2   : > { %1096 = vmatprep.subr.bf16.mxu0 %v3268_v26  ;;  %2647 = vmatprep.subr.bf16.mxu1 %v3119_v3 }
 0x267   : > { %v886_v50 = vpop.f32.mrb[8].mxu0  ;;  %v927_v11 = vpop.f32.mrb[8].mxu1 }
 0x268   : > { %v937_v12 = vrot.slane %v886_v50, 6  ;;  %v888_v13 = vpop.f32.mrb[9].mxu0  ;;  %v2625_v14 = vpop.f32.mrb[9].mxu1  ;;  %v956_v32 = vadd.f32 %v3412_v55, %v927_v11 }
 0x269   : > { %v947_v16 = vrot.slane %v888_v13, 6  ;;  %v890_v17 = vpop.f32.mrb[10].mxu0  ;;  %v930_v18 = vpop.f32.mrb[10].mxu1 }
 0x26a   : > { %v939_v19 = vadd.f32 %v937_v12, %v933_v15  ;;  %v891_v20 = vpop.f32.mrb[11].mxu0  ;;  %v2626_v21 = vpop.f32.mrb[11].mxu1  ;;  %v958_v58 = vrot.slane %v956_v32, 6  ;;  %v1057_v15 = vld [vmem:[#allocation4 + $0x10] sm:$0x30] }
 0x26b   : > { %v949_v24 = vadd.f32 %v947_v16, %v934_v23  ;;  %v2890_v32 = vld [vmem:[#allocation5 + $0xd8] ss:$12 sps:$4 sm:$0xff]  }
 0x26c   : > { %v2391_v22 = vmul.f32 -1.442695, %v939_v19 }
 0x26d   : > { %v2392_v25 = vmul.f32 -1.442695, %v949_v24 }
 0x26e   : > { %2968 = vpow2.f32 %v2391_v22 }
 0x26f   : > { %2970 = vpow2.f32 %v2392_v25 }
 0x278   : > { %v2969_v26 = vpop.eup %2968 }
 0x279   : > { %v943_v27 = vadd.f32 1.0, %v2969_v26  ;;  %v2971_v29 = vpop.eup %2970  ;;  %v2888_v26 = vld [vmem:[#allocation5 + $0xc4] ss:$12 sps:$4 sm:$0xff]  }
 0x27a   : > { %v953_v53 = vadd.f32 1.0, %v2971_v29  ;;  %v2889_v29 = vld [vmem:[#allocation5 + $0xc8] ss:$12 sps:$4 sm:$0xff]  }
 0x27b   : > { %2972 = vrcp.f32 %v943_v27  ;;  %v2886_v27 = vld [vmem:[#allocation5 + $0xc0] ss:$12 sps:$4 sm:$0xff]  }
 0x27c   : > { %2974 = vrcp.f32 %v953_v53  ;;  %v2893_v53 = vld [vmem:[#allocation5 + $0xe0] ss:$12 sps:$4 sm:$0xff]  }
 0x285   : > { %v2973_v60 = vpop.eup %2972 }
 0x286   : > { %v960_v61 = vmul.f32 %v2973_v60, %v958_v58  ;;  %v2975_v0 = vpop.eup %2974  ;;  %v2896_v58 = vld [vmem:[#allocation5 + $0xf4] ss:$12 sps:$4 sm:$0xff]   ;;  %v2894_v60 = vld [vmem:[#allocation5 + $0xf0] ss:$12 sps:$4 sm:$0xff]  }
 0x287   : > { %v963_v2 = vsub.f32 1.0, %v2975_v0  ;;  %v968_v8 = vmul.f32 %v2975_v0, %v966_v5  ;;  %v2901_v0 = vld [vmem:[#allocation5 + $0x110] ss:$12 sps:$4 sm:$0xff]  }
 0x288   : > { %v961_v63 = vadd.f32 %v960_v61, %v935_v62  ;;  %v2897_v61 = vld [vmem:[#allocation5 + $0xf8] ss:$12 sps:$4 sm:$0xff]  }
 0x289   : > { %v2900_v62 = vld [vmem:[#allocation5 + $0x10c] ss:$12 sps:$4 sm:$0xff]   ;;  %v2904_v5 = vld [vmem:[#allocation5 + $0x124] ss:$12 sps:$4 sm:$0xff]  }
 0x28a   : > { %2976 = vtanh.f32 %v961_v63  ;;  %v2898_v63 = vld [vmem:[#allocation5 + $0x108] ss:$12 sps:$4 sm:$0xff]  }
 0x294   : > { %v2977_v6 = vpop.eup %2976 }
 0x295   : > { %v964_v7 = vmul.f32 %v2977_v6, %v963_v2  ;;  %v2902_v2 = vld [vmem:[#allocation5 + $0x120] ss:$12 sps:$4 sm:$0xff]   ;;  %v2905_v6 = vld [vmem:[#allocation5 + $0x128] ss:$12 sps:$4 sm:$0xff]  }
 0x297   : > { %v3457_v10 = vadd.f32 %v968_v8, %v964_v7  ;;  %v2908_v7 = vld [vmem:[#allocation5 + $0x13c] ss:$12 sps:$4 sm:$0xff]   ;;  %v2906_v8 = vld [vmem:[#allocation5 + $0x138] ss:$12 sps:$4 sm:$0xff]  }
 0x299   : > { %v970_v50 = vpack.c.bf16 %v3457_v10, %v3457_v10  ;;  %v1088_v12 = vrot.slane %v3457_v10, 6  ;;  %v1216_v22 = vsel %vm1215_vm1, %v3416_v9, %v3457_v10  ;;  %v2892_v9 = vld [vmem:[#allocation5 + $0xdc] ss:$12 sps:$4 sm:$0xff]   ;;  %v2909_v10 = vld [vmem:[#allocation5 + $0x140] ss:$12 sps:$4 sm:$0xff]  }
 0x29b   : > { %v972_v11 = vrot.slane %v970_v50, 1  ;;  %v2912_v50 = vld [vmem:[#allocation5 + $0x154] ss:$12 sps:$4 sm:$0xff]  }
 0x29d   : > { %1007 = vmatmul.mubr.bf16.vlgmr.msra.gmra.mrb[12].mxu0 %v972_v11  ;;  %2644 = vmatmul.mubr.bf16.vlgmr.msra.gmra.mrb[12].mxu1 %v972_v11  ;;  %v2910_v11 = vld [vmem:[#allocation5 + $0x150] ss:$12 sps:$4 sm:$0xff]  }
 0x29e   : > { %1097 = vmatpush1.bf16.msra.mxu0 %v3271_v28  ;;  %2648 = vmatpush3.bf16.msra.mxu1 %v3289_v36 }
 0x29f   : > { %1098 = vmatprep.subr.bf16.mxu0 %v3274_v30  ;;  %2649 = vmatprep.subr.bf16.mxu1 %v3119_v3 }
 0x2a0   : > { %1128 = vmatprep.mubr.bf16.mxu0 %v3120_v4  ;;  %2663 = vmatprep.mubr.msk.bf16.mxu1 %vm3121_vm0, %v3119_v3 }
 0x2a2   : > { %1099 = vmatpush1.bf16.msra.mxu0 %v3277_v31  ;;  %2650 = vmatpush3.bf16.msra.mxu1 %v3296_v38 }
 0x2a3   : > { %1100 = vmatprep.subr.bf16.mxu0 %v3281_v33  ;;  %2651 = vmatprep.subr.bf16.mxu1 %v3119_v3 }
 0x2a6   : > { %1101 = vmatpush1.bf16.msra.mxu0 %v3284_v34  ;;  %2652 = vmatpush3.bf16.msra.mxu1 %v3306_v41 }
 0x2a7   : > { %1102 = vmatprep.subr.bf16.mxu0 %v3287_v35  ;;  %2653 = vmatprep.subr.bf16.mxu1 %v3119_v3  ;;  %v1055_v35 = vld [vmem:[#allocation4] sm:$0x30] }
 0x2aa   : > { %1103 = vmatpush1.bf16.msra.mxu0 %v3294_v37  ;;  %2654 = vmatpush3.bf16.msra.mxu1 %v3318_v44 }
 0x2ab   : > { %1104 = vmatprep.subr.bf16.mxu0 %v3298_v39  ;;  %2655 = vmatprep.subr.bf16.mxu1 %v3119_v3 }
 0x2ae   : > { %1105 = vmatpush1.bf16.msra.mxu0 %v3304_v40  ;;  %2656 = vmatpush3.bf16.msra.mxu1 %v3328_v47  ;;  %v1056_v40 = vld [vmem:[#allocation4 + $0x8] sm:$0x30] }
 0x2af   : > { %1106 = vmatprep.subr.bf16.mxu0 %v3310_v42  ;;  %2657 = vmatprep.subr.bf16.mxu1 %v3119_v3 }
 0x2b2   : > { %1107 = vmatpush1.bf16.msra.mxu0 %v3316_v43  ;;  %2658 = vmatpush3.bf16.msra.mxu1 %v3340_v51 }
 0x2b3   : > { %1108 = vmatprep.subr.bf16.mxu0 %v3320_v45  ;;  %2659 = vmatprep.subr.bf16.mxu1 %v3119_v3 }
 0x2b6   : > { %1109 = vmatpush1.bf16.msra.mxu0 %v3326_v46  ;;  %2660 = vmatpush3.bf16.msra.mxu1 %v3346_v52 }
 0x2b7   : > { %1110 = vmatprep.subr.bf16.mxu0 %v3330_v48  ;;  %2661 = vmatprep.subr.bf16.mxu1 %v3119_v3 }
 0x2ba   : > { %1111 = vmatpush1.bf16.msra.mxu0 %v3336_v49  ;;  %2662 = vmatpush3.bf16.msra.mxu1 %v3355_v54 }
 0x2bb   : > { %2667 = vmatprep.subr.bf16.mxu1 %v3119_v3  ;;  %1403 = vmatprep.subr.bf16.mxu0 %v2888_v26 }
 0x370   : > { %v1008_v28 = vpop.f32.mrb[12].mxu0  ;;  %v1049_v30 = vpop.f32.mrb[12].mxu1 }
 0x371   : > { %v1059_v31 = vrot.slane %v1008_v28, 4  ;;  %v1010_v33 = vpop.f32.mrb[13].mxu0  ;;  %v2645_v34 = vpop.f32.mrb[13].mxu1  ;;  %v1078_v51 = vadd.f32 %v3412_v55, %v1049_v30  ;;  %v2913_v28 = vld [vmem:[#allocation5 + $0x158] ss:$12 sps:$4 sm:$0xff]  }
 0x372   : > { %v1069_v36 = vrot.slane %v1010_v33, 4  ;;  %v1012_v37 = vpop.f32.mrb[14].mxu0  ;;  %v1052_v38 = vpop.f32.mrb[14].mxu1  ;;  %v2916_v30 = vld [vmem:[#allocation5 + $0x16c] ss:$12 sps:$4 sm:$0xff]  }
 0x373   : > { %v1061_v39 = vadd.f32 %v1059_v31, %v1055_v35  ;;  %v1013_v41 = vpop.f32.mrb[15].mxu0  ;;  %v2646_v42 = vpop.f32.mrb[15].mxu1  ;;  %v1080_v52 = vrot.slane %v1078_v51, 4  ;;  %v2914_v31 = vld [vmem:[#allocation5 + $0x168] ss:$12 sps:$4 sm:$0xff]  }
 0x374   : > { %v1071_v43 = vadd.f32 %v1069_v36, %v1056_v40  ;;  %v2917_v33 = vld [vmem:[#allocation5 + $0x170] ss:$12 sps:$4 sm:$0xff]   ;;  %v1177_v40 = vld [vmem:[#allocation4] sm:$0xc0] }
 0x375   : > { %v2393_v44 = vmul.f32 -1.442695, %v1061_v39  ;;  %v3517_v34 = vld [vmem:[#allocation7 + $0xc4] ss:$12 sps:$4 sm:$0xff]  }
 0x376   : > { %v2394_v45 = vmul.f32 -1.442695, %v1071_v43 }
 0x377   : > { %2978 = vpow2.f32 %v2393_v44 }
 0x378   : > { %2980 = vpow2.f32 %v2394_v45  ;;  %v1178_v45 = vld [vmem:[#allocation4 + $0x8] sm:$0xc0] }
 0x381   : > { %v2979_v46 = vpop.eup %2978 }
 0x382   : > { %v2981_v47 = vpop.eup %2980  ;;  %v1065_v48 = vadd.f32 1.0, %v2979_v46 }
 0x383   : > { %v1075_v49 = vadd.f32 1.0, %v2981_v47 }
 0x384   : > { %2982 = vrcp.f32 %v1065_v48 }
 0x385   : > { %2984 = vrcp.f32 %v1075_v49 }
 0x38e   : > { %v2983_v54 = vpop.eup %2982 }
 0x38f   : > { %v2985_v13 = vpop.eup %2984  ;;  %v1082_v14 = vmul.f32 %v2983_v54, %v1080_v52 }
 0x390   : > { %v1090_v16 = vmul.f32 %v2985_v13, %v1088_v12  ;;  %v1085_v18 = vsub.f32 1.0, %v2985_v13 }
 0x391   : > { %v1083_v17 = vadd.f32 %v1082_v14, %v1057_v15 }
 0x393   : > { %2986 = vtanh.f32 %v1083_v17 }
 0x39d   : > { %v2987_v19 = vpop.eup %2986 }
 0x39e   : > { %v1086_v20 = vmul.f32 %v2987_v19, %v1085_v18 }
 0x3a0   : > { %v3497_v21 = vadd.f32 %v1090_v16, %v1086_v20  ;;  %v1179_v20 = vld [vmem:[#allocation4 + $0x10] sm:$0xc0] }
 0x3a2   : > { %v1092_v23 = vpack.c.bf16 %v3497_v21, %v3497_v21  ;;  %v3506_v24 = vsel %vm1217_vm2, %v1216_v22, %v3497_v21  ;;  %v1210_v17 = vrot.slane %v3497_v21, 6 }
 0x3a4   : > { %v1094_v25 = vrot.slane %v1092_v23, 2 }
 0x3a6   : > { %1129 = vmatmul.mubr.bf16.vlgmr.msra.gmra.mrb[16].mxu0 %v1094_v25  ;;  %2664 = vmatmul.mubr.bf16.vlgmr.msra.gmra.mrb[16].mxu1 %v1094_v25 }
 0x3a7   : > { %1435 = vmatprep.mubr.bf16.mxu0 %v3120_v4  ;;  %2683 = vmatprep.mubr.msk.bf16.mxu1 %vm3121_vm0, %v3119_v3 }
 0x3a8   : > { %1404 = vmatpush1.bf16.msra.mxu0 %v2886_v27  ;;  %2668 = vmatpush3.bf16.msra.mxu1 %v2889_v29 }
 0x3a9   : > { %2669 = vmatprep.subr.bf16.mxu1 %v3119_v3  ;;  %1405 = vmatprep.subr.bf16.mxu0 %v2892_v9 }
 0x3ac   : > { %1406 = vmatpush1.bf16.msra.mxu0 %v2890_v32  ;;  %2670 = vmatpush3.bf16.msra.mxu1 %v2893_v53  ;;  %v3528_v32 = vld [vmem:[#allocation7 + $0xc8] ss:$12 sps:$4 sm:$0xff]  }
 0x3ad   : > { %2671 = vmatprep.subr.bf16.mxu1 %v3119_v3  ;;  %1407 = vmatprep.subr.bf16.mxu0 %v2896_v58  ;;  %v3530_v53 = vld [vmem:[#allocation7 + $0xdc] ss:$12 sps:$4 sm:$0xff]   ;;  %v3533_v58 = vld [vmem:[#allocation7 + $0xd8] ss:$12 sps:$4 sm:$0xff]  }
 0x3b0   : > { %1408 = vmatpush1.bf16.msra.mxu0 %v2894_v60  ;;  %2672 = vmatpush3.bf16.msra.mxu1 %v2897_v61  ;;  %v3536_v60 = vld [vmem:[#allocation7 + $0xe0] ss:$12 sps:$4 sm:$0xff]   ;;  %v3546_v61 = vld [vmem:[#allocation7 + $0xf0] ss:$12 sps:$4 sm:$0xff]  }
 0x3b1   : > { %2673 = vmatprep.subr.bf16.mxu1 %v3119_v3  ;;  %1409 = vmatprep.subr.bf16.mxu0 %v2900_v62  ;;  %v3549_v62 = vld [vmem:[#allocation7 + $0xf8] ss:$12 sps:$4 sm:$0xff]  }
 0x3b4   : > { %1410 = vmatpush1.bf16.msra.mxu0 %v2898_v63  ;;  %2674 = vmatpush3.bf16.msra.mxu1 %v2901_v0  ;;  %v3552_v63 = vld [vmem:[#allocation7 + $0x10c] ss:$12 sps:$4 sm:$0xff]   ;;  %v3556_v0 = vld [vmem:[#allocation7 + $0x108] ss:$12 sps:$4 sm:$0xff]  }
 0x3b5   : > { %1411 = vmatprep.subr.bf16.mxu0 %v2904_v5  ;;  %2675 = vmatprep.subr.bf16.mxu1 %v3119_v3  ;;  %v3562_v5 = vld [vmem:[#allocation7 + $0x124] ss:$12 sps:$4 sm:$0xff]  }
 0x3b8   : > { %1412 = vmatpush1.bf16.msra.mxu0 %v2902_v2  ;;  %2676 = vmatpush3.bf16.msra.mxu1 %v2905_v6  ;;  %v3559_v2 = vld [vmem:[#allocation7 + $0x110] ss:$12 sps:$4 sm:$0xff]   ;;  %v3566_v6 = vld [vmem:[#allocation7 + $0x120] ss:$12 sps:$4 sm:$0xff]  }
 0x3b9   : > { %1413 = vmatprep.subr.bf16.mxu0 %v2908_v7  ;;  %2677 = vmatprep.subr.bf16.mxu1 %v3119_v3  ;;  %v3569_v7 = vld [vmem:[#allocation7 + $0x128] ss:$12 sps:$4 sm:$0xff]  }
 0x3bc   : > { %1414 = vmatpush1.bf16.msra.mxu0 %v2906_v8  ;;  %2678 = vmatpush3.bf16.msra.mxu1 %v2909_v10  ;;  %v3572_v8 = vld [vmem:[#allocation7 + $0x13c] ss:$12 sps:$4 sm:$0xff]   ;;  %v3576_v10 = vld [vmem:[#allocation7 + $0x138] ss:$12 sps:$4 sm:$0xff]  }
 0x3bd   : > { %1415 = vmatprep.subr.bf16.mxu0 %v2912_v50  ;;  %2679 = vmatprep.subr.bf16.mxu1 %v3119_v3  ;;  %v3579_v50 = vld [vmem:[#allocation7 + $0x140] ss:$12 sps:$4 sm:$0xff]  }
 0x3c0   : > { %1416 = vmatpush1.bf16.msra.mxu0 %v2910_v11  ;;  %2680 = vmatpush3.bf16.msra.mxu1 %v2913_v28  ;;  %v3582_v11 = vld [vmem:[#allocation7 + $0x154] ss:$12 sps:$4 sm:$0xff]   ;;  %v3586_v28 = vld [vmem:[#allocation7 + $0x150] ss:$12 sps:$4 sm:$0xff]  }
 0x3c1   : > { %1417 = vmatprep.subr.bf16.mxu0 %v2916_v30  ;;  %2681 = vmatprep.subr.bf16.mxu1 %v3119_v3  ;;  %v3589_v30 = vld [vmem:[#allocation7 + $0x158] ss:$12 sps:$4 sm:$0xff]  }
 0x3c4   : > { %1418 = vmatpush1.bf16.msra.mxu0 %v2914_v31  ;;  %2682 = vmatpush3.bf16.msra.mxu1 %v2917_v33  ;;  %v3592_v31 = vld [vmem:[#allocation7 + $0x16c] ss:$12 sps:$4 sm:$0xff]   ;;  %v3596_v33 = vld [vmem:[#allocation7 + $0x168] ss:$12 sps:$4 sm:$0xff]  }
 0x3c5   : > { %1653 = vmatprep.subr.bf16.mxu0 %v3517_v34  ;;  %2687 = vmatprep.subr.bf16.mxu1 %v3119_v3 }
 0x479   : > { %v1130_v35 = vpop.f32.mrb[16].mxu0  ;;  %v1171_v36 = vpop.f32.mrb[16].mxu1 }
 0x47a   : > { %v1181_v37 = vrot.slane %v1130_v35, 2  ;;  %v1132_v38 = vpop.f32.mrb[17].mxu0  ;;  %v2665_v39 = vpop.f32.mrb[17].mxu1  ;;  %v1200_v14 = vadd.f32 %v3412_v55, %v1171_v36  ;;  %v3526_v55 = vld [vmem:[#allocation7 + $0xc0] ss:$12 sps:$4 sm:$0xff]  }
 0x47b   : > { %v1191_v41 = vrot.slane %v1132_v38, 2  ;;  %v1134_v42 = vpop.f32.mrb[18].mxu0  ;;  %v1174_v43 = vpop.f32.mrb[18].mxu1  ;;  %v3598_v35 = vld [vmem:[#allocation2 + $0x2] sm:$0x3] }
 0x47c   : > { %v1183_v44 = vadd.f32 %v1181_v37, %v1177_v40  ;;  %v1135_v46 = vpop.f32.mrb[19].mxu0  ;;  %v2666_v47 = vpop.f32.mrb[19].mxu1  ;;  %v1202_v15 = vrot.slane %v1200_v14, 2  ;;  %v3601_v36 = vld [vmem:[#allocation7 + $0x170] ss:$12 sps:$4 sm:$0xff]   ;;  %v1524_v37 = vpack.c.bf16 %v3598_v35, %v3598_v35 }
 0x47d   : > { %v1193_v48 = vadd.f32 %v1191_v41, %v1178_v45  ;;  %v2397_v38 = vld [vmem:[%s3801_s3 + $0x3] sm:$0x7] }
 0x47e   : > { %v2395_v49 = vmul.f32 -1.442695, %v1183_v44  ;;  %v1263_v39 = vrot.slane %v2397_v38, %v351_v57  ;;  %v1271_v40 = vrot.slane %v2397_v38, %v359_v1  ;;  %v1267_v41 = vrot.slane %v2397_v38, %v355_v59 }
 0x47f   : > { %v2396_v51 = vmul.f32 -1.442695, %v1193_v48 }
 0x480   : > { %2988 = vpow2.f32 %v2395_v49 }
 0x481   : > { %2990 = vpow2.f32 %v2396_v51 }
 0x48a   : > { %v2989_v52 = vpop.eup %2988 }
 0x48b   : > { %v2991_v54 = vpop.eup %2990  ;;  %v1187_v12 = vadd.f32 1.0, %v2989_v52 }
 0x48c   : > { %v1197_v13 = vadd.f32 1.0, %v2991_v54 }
 0x48d   : > { %2992 = vrcp.f32 %v1187_v12 }
 0x48e   : > { %2994 = vrcp.f32 %v1197_v13 }
 0x497   : > { %v2993_v16 = vpop.eup %2992 }
 0x498   : > { %v2995_v18 = vpop.eup %2994  ;;  %v1204_v19 = vmul.f32 %v2993_v16, %v1202_v15 }
 0x499   : > { %v1212_v22 = vmul.f32 %v2995_v18, %v1210_v17  ;;  %v1207_v25 = vsub.f32 1.0, %v2995_v18 }
 0x49a   : > { %v1205_v23 = vadd.f32 %v1204_v19, %v1179_v20 }
 0x49c   : > { %2996 = vtanh.f32 %v1205_v23 }
 0x4a6   : > { %v2997_v26 = vpop.eup %2996 }
 0x4a7   : > { %v1208_v27 = vmul.f32 %v2997_v26, %v1207_v25 }
 0x4a9   : > { %v1213_v29 = vadd.f32 %v1212_v22, %v1208_v27  ;;  %v3658_v27 = vld [vmem:[%s3802_s4 + $0x1] ss:$0 sm:$0xff] }
 0x4ab   : > { %1214 = vst [vmem:[#allocation2 - $0x6] sm:$0xc0] %v1213_v29  ;;  %v1220_v9 = vsel %vm1219_vm3, %v3506_v24, %v1213_v29  ;;  %v3539_v24 = vld [vmem:[#allocation7 + $0xf4] ss:$12 sps:$4 sm:$0xff]  }
 0x4ac   : > { %v1223_v21 = vpack.c.bf16 %v1220_v9, %v1220_v9 }
 0x4ae   : > { %1436 = vmatmul.mubr.bf16.vlgmr.msra.gmra.mrb[20].mxu0 %v1223_v21  ;;  %2684 = vmatmul.mubr.bf16.vlgmr.msra.gmra.mrb[20].mxu1 %v1223_v21 }
 0x4af   : > { %1654 = vmatpush1.bf16.msra.mxu0 %v3526_v55  ;;  %2688 = vmatpush3.bf16.msra.mxu1 %v3528_v32 }
 0x4b0   : > { %1655 = vmatprep.subr.bf16.mxu0 %v3530_v53  ;;  %2689 = vmatprep.subr.bf16.mxu1 %v3119_v3 }
 0x4b1   : > { %1685 = vmatprep.mubr.bf16.mxu0 %v3120_v4  ;;  %2703 = vmatprep.mubr.msk.bf16.mxu1 %vm3121_vm0, %v3119_v3 }
 0x4b3   : > { %1656 = vmatpush1.bf16.msra.mxu0 %v3533_v58  ;;  %2690 = vmatpush3.bf16.msra.mxu1 %v3536_v60 }
 0x4b4   : > { %1657 = vmatprep.subr.bf16.mxu0 %v3539_v24  ;;  %2691 = vmatprep.subr.bf16.mxu1 %v3119_v3 }
 0x4b7   : > { %1658 = vmatpush1.bf16.msra.mxu0 %v3546_v61  ;;  %2692 = vmatpush3.bf16.msra.mxu1 %v3549_v62 }
 0x4b8   : > { %1659 = vmatprep.subr.bf16.mxu0 %v3552_v63  ;;  %2693 = vmatprep.subr.bf16.mxu1 %v3119_v3 }
 0x4bb   : > { %1660 = vmatpush1.bf16.msra.mxu0 %v3556_v0  ;;  %2694 = vmatpush3.bf16.msra.mxu1 %v3559_v2 }
 0x4bc   : > { %1661 = vmatprep.subr.bf16.mxu0 %v3562_v5  ;;  %2695 = vmatprep.subr.bf16.mxu1 %v3119_v3 }
 0x4bf   : > { %1662 = vmatpush1.bf16.msra.mxu0 %v3566_v6  ;;  %2696 = vmatpush3.bf16.msra.mxu1 %v3569_v7 }
 0x4c0   : > { %1663 = vmatprep.subr.bf16.mxu0 %v3572_v8  ;;  %2697 = vmatprep.subr.bf16.mxu1 %v3119_v3 }
 0x4c3   : > { %1664 = vmatpush1.bf16.msra.mxu0 %v3576_v10  ;;  %2698 = vmatpush3.bf16.msra.mxu1 %v3579_v50 }
 0x4c4   : > { %1665 = vmatprep.subr.bf16.mxu0 %v3582_v11  ;;  %2699 = vmatprep.subr.bf16.mxu1 %v3119_v3 }
 0x4c7   : > { %1666 = vmatpush1.bf16.msra.mxu0 %v3586_v28  ;;  %2700 = vmatpush3.bf16.msra.mxu1 %v3589_v30 }
 0x4c8   : > { %1667 = vmatprep.subr.bf16.mxu0 %v3592_v31  ;;  %2701 = vmatprep.subr.bf16.mxu1 %v3119_v3 }
 0x4cb   : > { %1668 = vmatpush1.bf16.msra.mxu0 %v3596_v33  ;;  %2702 = vmatpush3.bf16.msra.mxu1 %v3601_v36 }
 0x4cc   : > { %1766 = vmatprep.subr.bf16.mxu0 %v3517_v34  ;;  %2707 = vmatprep.subr.bf16.mxu1 %v3119_v3 }
 0x4ce   : > { %1686 = vmatmul.mubr.bf16.vlgmr.msra.gmra.mrb[24].mxu0 %v1524_v37  ;;  %2704 = vmatmul.mubr.bf16.vlgmr.msra.gmra.mrb[24].mxu1 %v1524_v37 }
 0x4cf   : > { %1767 = vmatpush1.bf16.msra.mxu0 %v3526_v55  ;;  %2708 = vmatpush3.bf16.msra.mxu1 %v3528_v32 }
 0x4d0   : > { %1768 = vmatprep.subr.bf16.mxu0 %v3530_v53  ;;  %2709 = vmatprep.subr.bf16.mxu1 %v3119_v3 }
 0x4d1   : > { %1798 = vmatprep.mubr.bf16.mxu0 %v3120_v4  ;;  %2723 = vmatprep.mubr.msk.bf16.mxu1 %vm3121_vm0, %v3119_v3 }
 0x4d3   : > { %1769 = vmatpush1.bf16.msra.mxu0 %v3533_v58  ;;  %2710 = vmatpush3.bf16.msra.mxu1 %v3536_v60 }
 0x4d4   : > { %1770 = vmatprep.subr.bf16.mxu0 %v3539_v24  ;;  %2711 = vmatprep.subr.bf16.mxu1 %v3119_v3 }
 0x4d7   : > { %1771 = vmatpush1.bf16.msra.mxu0 %v3546_v61  ;;  %2712 = vmatpush3.bf16.msra.mxu1 %v3549_v62 }
 0x4d8   : > { %1772 = vmatprep.subr.bf16.mxu0 %v3552_v63  ;;  %2713 = vmatprep.subr.bf16.mxu1 %v3119_v3 }
 0x4db   : > { %1773 = vmatpush1.bf16.msra.mxu0 %v3556_v0  ;;  %2714 = vmatpush3.bf16.msra.mxu1 %v3559_v2 }
 0x4dc   : > { %1774 = vmatprep.subr.bf16.mxu0 %v3562_v5  ;;  %2715 = vmatprep.subr.bf16.mxu1 %v3119_v3 }
 0x4df   : > { %1775 = vmatpush1.bf16.msra.mxu0 %v3566_v6  ;;  %2716 = vmatpush3.bf16.msra.mxu1 %v3569_v7 }
 0x4e0   : > { %1776 = vmatprep.subr.bf16.mxu0 %v3572_v8  ;;  %2717 = vmatprep.subr.bf16.mxu1 %v3119_v3 }
 0x4e3   : > { %1777 = vmatpush1.bf16.msra.mxu0 %v3576_v10  ;;  %2718 = vmatpush3.bf16.msra.mxu1 %v3579_v50 }
 0x4e4   : > { %1778 = vmatprep.subr.bf16.mxu0 %v3582_v11  ;;  %2719 = vmatprep.subr.bf16.mxu1 %v3119_v3 }
 0x4e7   : > { %1779 = vmatpush1.bf16.msra.mxu0 %v3586_v28  ;;  %2720 = vmatpush3.bf16.msra.mxu1 %v3589_v30 }
 0x4e8   : > { %1780 = vmatprep.subr.bf16.mxu0 %v3592_v31  ;;  %2721 = vmatprep.subr.bf16.mxu1 %v3119_v3 }
 0x4eb   : > { %1781 = vmatpush1.bf16.msra.mxu0 %v3596_v33  ;;  %2722 = vmatpush3.bf16.msra.mxu1 %v3601_v36 }
 0x4ec   : > { %1888 = vmatprep.subr.bf16.mxu0 %v3517_v34  ;;  %2727 = vmatprep.subr.bf16.mxu1 %v3119_v3 }
 0x581   : > { %v1437_v42 = vpop.f32.mrb[20].mxu0  ;;  %v1478_v43 = vpop.f32.mrb[20].mxu1 }
 0x582   : > { %v1438_v44 = vadd.f32 %v1437_v42, %v1263_v39  ;;  %v1479_v45 = vadd.f32 %v1478_v43, %v1271_v40  ;;  %v1439_v46 = vpop.f32.mrb[21].mxu0  ;;  %v2685_v47 = vpop.f32.mrb[21].mxu1 }
 0x583   : > { %v1440_v48 = vadd.f32 %v1439_v46, %v1267_v41  ;;  %v1441_v49 = vpop.f32.mrb[22].mxu0  ;;  %v1481_v51 = vpop.f32.mrb[22].mxu1 }
 0x584   : > { %1484 = vst [vmem:[#allocation4] sm:$0xff] %v1438_v44  ;;  %1486 = vst [vmem:[#allocation4 + $0x10] sm:$0xff] %v1479_v45  ;;  %v1442_v52 = vpop.f32.mrb[23].mxu0  ;;  %v2686_v54 = vpop.f32.mrb[23].mxu1 }
 0x585   : > { %1485 = vst [vmem:[#allocation4 + $0x8] sm:$0xff] %v1440_v48 }
 0x58b   : > { %v1734_v12 = vld [vmem:[#allocation4] sm:$0x3]  ;;  %v1736_v38 = vld [vmem:[#allocation4 + $0x10] sm:$0x3]  ;;  %v1847_v52 = vld [vmem:[#allocation4] sm:$0xc] }
 0x58c   : > { %v1735_v17 = vld [vmem:[#allocation4 + $0x8] sm:$0x3] }
 0x5a1   : > { %v1687_v57 = vpop.f32.mrb[24].mxu0  ;;  %v1728_v1 = vpop.f32.mrb[24].mxu1 }
 0x5a2   : > { %v1737_v13 = vadd.f32 %v1734_v12, %v1687_v57  ;;  %v1689_v56 = vpop.f32.mrb[25].mxu0  ;;  %v2705_v59 = vpop.f32.mrb[25].mxu1  ;;  %v1757_v9 = vadd.f32 %v3658_v27, %v1728_v1 }
 0x5a3   : > { %v1691_v14 = vpop.f32.mrb[26].mxu0  ;;  %v1731_v15 = vpop.f32.mrb[26].mxu1  ;;  %v1744_v20 = vadd.f32 %v1735_v17, %v1689_v56 }
 0x5a4   : > { %v2447_v16 = vmul.f32 -1.442695, %v1737_v13  ;;  %v1692_v18 = vpop.f32.mrb[27].mxu0  ;;  %v2706_v19 = vpop.f32.mrb[27].mxu1  ;;  %v1848_v14 = vld [vmem:[#allocation4 + $0x8] sm:$0xc] }
 0x5a5   : > { %v2448_v22 = vmul.f32 -1.442695, %v1744_v20 }
 0x5a6   : > { %2998 = vpow2.f32 %v2447_v16 }
 0x5a7   : > { %3000 = vpow2.f32 %v2448_v22 }
 0x5b0   : > { %v2999_v23 = vpop.eup %2998 }
 0x5b1   : > { %v1741_v25 = vadd.f32 1.0, %v2999_v23  ;;  %v3001_v26 = vpop.eup %3000 }
 0x5b2   : > { %v1748_v29 = vadd.f32 1.0, %v3001_v26  ;;  %v1849_v26 = vld [vmem:[#allocation4 + $0x10] sm:$0xc] }
 0x5b3   : > { %3002 = vrcp.f32 %v1741_v25 }
 0x5b4   : > { %3004 = vrcp.f32 %v1748_v29 }
 0x5bd   : > { %v3003_v21 = vpop.eup %3002 }
 0x5be   : > { %v1758_v37 = vmul.f32 %v3003_v21, %v1757_v9  ;;  %v3005_v40 = vpop.eup %3004 }
 0x5bf   : > { %v1761_v41 = vsub.f32 1.0, %v3005_v40  ;;  %v1763_v44 = vmul.f32 %v3005_v40, %v3598_v35 }
 0x5c0   : > { %v1759_v39 = vadd.f32 %v1758_v37, %v1736_v38 }
 0x5c2   : > { %3006 = vtanh.f32 %v1759_v39 }
 0x5cc   : > { %v3007_v42 = vpop.eup %3006 }
 0x5cd   : > { %v1762_v43 = vmul.f32 %v3007_v42, %v1761_v41 }
 0x5cf   : > { %v3662_v45 = vadd.f32 %v1763_v44, %v1762_v43 }
 0x5d1   : > { %v1765_v46 = vpack.c.bf16 %v3662_v45, %v3662_v45  ;;  %v1880_v37 = vrot.slane %v3662_v45, 6 }
 0x5d3   : > { %1799 = vmatmul.mubr.bf16.vlgmr.msra.gmra.mrb[28].mxu0 %v1765_v46  ;;  %2724 = vmatmul.mubr.bf16.vlgmr.msra.gmra.mrb[28].mxu1 %v1765_v46 }
 0x5d4   : > { %1889 = vmatpush1.bf16.msra.mxu0 %v3526_v55  ;;  %2728 = vmatpush3.bf16.msra.mxu1 %v3528_v32 }
 0x5d5   : > { %1890 = vmatprep.subr.bf16.mxu0 %v3530_v53  ;;  %2729 = vmatprep.subr.bf16.mxu1 %v3119_v3 }
 0x5d6   : > { %1920 = vmatprep.mubr.bf16.mxu0 %v3120_v4  ;;  %2743 = vmatprep.mubr.msk.bf16.mxu1 %vm3121_vm0, %v3119_v3 }
 0x5d8   : > { %1891 = vmatpush1.bf16.msra.mxu0 %v3533_v58  ;;  %2730 = vmatpush3.bf16.msra.mxu1 %v3536_v60 }
 0x5d9   : > { %1892 = vmatprep.subr.bf16.mxu0 %v3539_v24  ;;  %2731 = vmatprep.subr.bf16.mxu1 %v3119_v3 }
 0x5dc   : > { %1893 = vmatpush1.bf16.msra.mxu0 %v3546_v61  ;;  %2732 = vmatpush3.bf16.msra.mxu1 %v3549_v62 }
 0x5dd   : > { %1894 = vmatprep.subr.bf16.mxu0 %v3552_v63  ;;  %2733 = vmatprep.subr.bf16.mxu1 %v3119_v3 }
 0x5e0   : > { %1895 = vmatpush1.bf16.msra.mxu0 %v3556_v0  ;;  %2734 = vmatpush3.bf16.msra.mxu1 %v3559_v2 }
 0x5e1   : > { %1896 = vmatprep.subr.bf16.mxu0 %v3562_v5  ;;  %2735 = vmatprep.subr.bf16.mxu1 %v3119_v3 }
 0x5e4   : > { %1897 = vmatpush1.bf16.msra.mxu0 %v3566_v6  ;;  %2736 = vmatpush3.bf16.msra.mxu1 %v3569_v7 }
 0x5e5   : > { %1898 = vmatprep.subr.bf16.mxu0 %v3572_v8  ;;  %2737 = vmatprep.subr.bf16.mxu1 %v3119_v3 }
 0x5e8   : > { %1899 = vmatpush1.bf16.msra.mxu0 %v3576_v10  ;;  %2738 = vmatpush3.bf16.msra.mxu1 %v3579_v50 }
 0x5e9   : > { %1900 = vmatprep.subr.bf16.mxu0 %v3582_v11  ;;  %2739 = vmatprep.subr.bf16.mxu1 %v3119_v3 }
 0x5ec   : > { %1901 = vmatpush1.bf16.msra.mxu0 %v3586_v28  ;;  %2740 = vmatpush3.bf16.msra.mxu1 %v3589_v30 }
 0x5ed   : > { %1902 = vmatprep.subr.bf16.mxu0 %v3592_v31  ;;  %2741 = vmatprep.subr.bf16.mxu1 %v3119_v3 }
 0x5f0   : > { %1903 = vmatpush1.bf16.msra.mxu0 %v3596_v33  ;;  %2742 = vmatpush3.bf16.msra.mxu1 %v3601_v36 }
 0x5f1   : > { %2010 = vmatprep.subr.bf16.mxu0 %v3517_v34  ;;  %2747 = vmatprep.subr.bf16.mxu1 %v3119_v3 }
 0x6a6   : > { %v1800_v35 = vpop.f32.mrb[28].mxu0  ;;  %v1841_v47 = vpop.f32.mrb[28].mxu1 }
 0x6a7   : > { %v1851_v48 = vrot.slane %v1800_v35, 6  ;;  %v1802_v49 = vpop.f32.mrb[29].mxu0  ;;  %v2725_v51 = vpop.f32.mrb[29].mxu1  ;;  %v1870_v19 = vadd.f32 %v3658_v27, %v1841_v47  ;;  %v1971_v35 = vld [vmem:[#allocation4 + $0x10] sm:$0x30] }
 0x6a8   : > { %v1861_v54 = vrot.slane %v1802_v49, 6  ;;  %v1804_v57 = vpop.f32.mrb[30].mxu0  ;;  %v1844_v12 = vpop.f32.mrb[30].mxu1 }
 0x6a9   : > { %v1853_v1 = vadd.f32 %v1851_v48, %v1847_v52  ;;  %v1805_v13 = vpop.f32.mrb[31].mxu0  ;;  %v2726_v56 = vpop.f32.mrb[31].mxu1  ;;  %v1872_v22 = vrot.slane %v1870_v19, 6 }
 0x6aa   : > { %v1863_v15 = vadd.f32 %v1861_v54, %v1848_v14  ;;  %v2950_v56 = vld [vmem:[%s3803_s5] sm:$0xff]   ;;  %v2953_v14 = vld [vmem:[%s3803_s5 + $0x18] sm:$0xff]  }
 0x6ab   : > { %v2450_v59 = vmul.f32 -1.442695, %v1853_v1 }
 0x6ac   : > { %v2451_v16 = vmul.f32 -1.442695, %v1863_v15  ;;  %v2954_v15 = vld [vmem:[%s3803_s5 + $0x20] sm:$0xff]  }
 0x6ad   : > { %3008 = vpow2.f32 %v2450_v59  ;;  %v2952_v59 = vld [vmem:[%s3803_s5 + $0x10] sm:$0xff]  }
 0x6ae   : > { %3010 = vpow2.f32 %v2451_v16  ;;  %v2955_v16 = vld [vmem:[%s3803_s5 + $0x28] sm:$0xff]  }
 0x6b7   : > { %v3009_v34 = vpop.eup %3008 }
 0x6b8   : > { %v1857_v17 = vadd.f32 1.0, %v3009_v34  ;;  %v3011_v18 = vpop.eup %3010  ;;  %v2956_v34 = vld [vmem:[%s3803_s5 + $0x30] sm:$0xff]  }
 0x6b9   : > { %v1867_v20 = vadd.f32 1.0, %v3011_v18 }
 0x6ba   : > { %3012 = vrcp.f32 %v1857_v17  ;;  %v2957_v17 = vld [vmem:[%s3803_s5 + $0x38] sm:$0xff]  }
 0x6bb   : > { %3014 = vrcp.f32 %v1867_v20 }
 0x6c4   : > { %v3013_v23 = vpop.eup %3012 }
 0x6c5   : > { %v1874_v25 = vmul.f32 %v3013_v23, %v1872_v22  ;;  %v3015_v9 = vpop.eup %3014 }
 0x6c6   : > { %v1877_v21 = vsub.f32 1.0, %v3015_v9  ;;  %v1882_v40 = vmul.f32 %v3015_v9, %v1880_v37  ;;  %v2092_v37 = vld [vmem:[#allocation4 + $0x8] sm:$0xc0] }
 0x6c7   : > { %v1875_v29 = vadd.f32 %v1874_v25, %v1849_v26  ;;  %v2091_v25 = vld [vmem:[#allocation4] sm:$0xc0] }
 0x6c9   : > { %3016 = vtanh.f32 %v1875_v29 }
 0x6d3   : > { %v3017_v38 = vpop.eup %3016 }
 0x6d4   : > { %v1878_v39 = vmul.f32 %v3017_v38, %v1877_v21 }
 0x6d6   : > { %v3703_v41 = vadd.f32 %v1882_v40, %v1878_v39 }
 0x6d8   : > { %v1884_v42 = vpack.c.bf16 %v3703_v41, %v3703_v41  ;;  %v2129_v57 = vsel %vm1215_vm1, %v3662_v45, %v3703_v41  ;;  %v2951_v45 = vld [vmem:[%s3803_s5 + $0x8] sm:$0xff]  }
 0x6da   : > { %v1886_v43 = vrot.slane %v1884_v42, 1 }
 0x6dc   : > { %1921 = vmatmul.mubr.bf16.vlgmr.msra.gmra.mrb[32].mxu0 %v1886_v43  ;;  %2744 = vmatmul.mubr.bf16.vlgmr.msra.gmra.mrb[32].mxu1 %v1886_v43 }
 0x6dd   : > { %2011 = vmatpush1.bf16.msra.mxu0 %v3526_v55  ;;  %2748 = vmatpush3.bf16.msra.mxu1 %v3528_v32 }
 0x6de   : > { %2012 = vmatprep.subr.bf16.mxu0 %v3530_v53  ;;  %2749 = vmatprep.subr.bf16.mxu1 %v3119_v3 }
 0x6df   : > { %2042 = vmatprep.mubr.bf16.mxu0 %v3120_v4  ;;  %2763 = vmatprep.mubr.msk.bf16.mxu1 %vm3121_vm0, %v3119_v3 }
 0x6e1   : > { %2013 = vmatpush1.bf16.msra.mxu0 %v3533_v58  ;;  %2750 = vmatpush3.bf16.msra.mxu1 %v3536_v60  ;;  %v1969_v60 = vld [vmem:[#allocation4] sm:$0x30] }
 0x6e2   : > { %2014 = vmatprep.subr.bf16.mxu0 %v3539_v24  ;;  %2751 = vmatprep.subr.bf16.mxu1 %v3119_v3 }
 0x6e5   : > { %2015 = vmatpush1.bf16.msra.mxu0 %v3546_v61  ;;  %2752 = vmatpush3.bf16.msra.mxu1 %v3549_v62 }
 0x6e6   : > { %2016 = vmatprep.subr.bf16.mxu0 %v3552_v63  ;;  %2753 = vmatprep.subr.bf16.mxu1 %v3119_v3 }
 0x6e9   : > { %2017 = vmatpush1.bf16.msra.mxu0 %v3556_v0  ;;  %2754 = vmatpush3.bf16.msra.mxu1 %v3559_v2  ;;  %v1970_v0 = vld [vmem:[#allocation4 + $0x8] sm:$0x30] }
 0x6ea   : > { %2018 = vmatprep.subr.bf16.mxu0 %v3562_v5  ;;  %2755 = vmatprep.subr.bf16.mxu1 %v3119_v3 }
 0x6ed   : > { %2019 = vmatpush1.bf16.msra.mxu0 %v3566_v6  ;;  %2756 = vmatpush3.bf16.msra.mxu1 %v3569_v7 }
 0x6ee   : > { %2020 = vmatprep.subr.bf16.mxu0 %v3572_v8  ;;  %2757 = vmatprep.subr.bf16.mxu1 %v3119_v3 }
 0x6f1   : > { %2021 = vmatpush1.bf16.msra.mxu0 %v3576_v10  ;;  %2758 = vmatpush3.bf16.msra.mxu1 %v3579_v50 }
 0x6f2   : > { %2022 = vmatprep.subr.bf16.mxu0 %v3582_v11  ;;  %2759 = vmatprep.subr.bf16.mxu1 %v3119_v3 }
 0x6f5   : > { %2023 = vmatpush1.bf16.msra.mxu0 %v3586_v28  ;;  %2760 = vmatpush3.bf16.msra.mxu1 %v3589_v30 }
 0x6f6   : > { %2024 = vmatprep.subr.bf16.mxu0 %v3592_v31  ;;  %2761 = vmatprep.subr.bf16.mxu1 %v3119_v3 }
 0x6f9   : > { %2025 = vmatpush1.bf16.msra.mxu0 %v3596_v33  ;;  %2762 = vmatpush3.bf16.msra.mxu1 %v3601_v36  ;;  %v2002_v36 = vrot.slane %v3703_v41, 6 }
 0x6fa   : > { %2767 = vmatprep.subr.bf16.mxu0 %v3119_v3 }
 0x7af   : > { %v1922_v4 = vpop.f32.mrb[32].mxu0  ;;  %v1963_v55 = vpop.f32.mrb[32].mxu1 }
 0x7b0   : > { %v1973_v32 = vrot.slane %v1922_v4, 4  ;;  %v1924_v53 = vpop.f32.mrb[33].mxu0  ;;  %v2745_v58 = vpop.f32.mrb[33].mxu1  ;;  %v1992_v30 = vadd.f32 %v3658_v27, %v1963_v55 }
 0x7b1   : > { %v1983_v24 = vrot.slane %v1924_v53, 4  ;;  %v1926_v61 = vpop.f32.mrb[34].mxu0  ;;  %v1966_v62 = vpop.f32.mrb[34].mxu1 }
 0x7b2   : > { %v1975_v63 = vadd.f32 %v1973_v32, %v1969_v60  ;;  %v1927_v2 = vpop.f32.mrb[35].mxu0  ;;  %v2746_v5 = vpop.f32.mrb[35].mxu1  ;;  %v1994_v31 = vrot.slane %v1992_v30, 4  ;;  %v2093_v62 = vld [vmem:[#allocation4 + $0x10] sm:$0xc0] }
 0x7b3   : > { %v1985_v6 = vadd.f32 %v1983_v24, %v1970_v0 }
 0x7b4   : > { %v2452_v7 = vmul.f32 -1.442695, %v1975_v63 }
 0x7b5   : > { %v2453_v8 = vmul.f32 -1.442695, %v1985_v6 }
 0x7b6   : > { %3018 = vpow2.f32 %v2452_v7 }
 0x7b7   : > { %3020 = vpow2.f32 %v2453_v8 }
 0x7c0   : > { %v3019_v10 = vpop.eup %3018 }
 0x7c1   : > { %v3021_v50 = vpop.eup %3020  ;;  %v1979_v11 = vadd.f32 1.0, %v3019_v10  ;;  %v2456_v10 = vld [vmem:[%s3804_s6] ss:$0 sm:$0xff] }
 0x7c2   : > { %v1989_v28 = vadd.f32 1.0, %v3021_v50 }
 0x7c3   : > { %3022 = vrcp.f32 %v1979_v11 }
 0x7c4   : > { %3024 = vrcp.f32 %v1989_v28 }
 0x7cd   : > { %v3023_v33 = vpop.eup %3022 }
 0x7ce   : > { %v3025_v44 = vpop.eup %3024  ;;  %v1996_v46 = vmul.f32 %v3023_v33, %v1994_v31 }
 0x7cf   : > { %v2004_v47 = vmul.f32 %v3025_v44, %v2002_v36  ;;  %v1999_v49 = vsub.f32 1.0, %v3025_v44 }
 0x7d0   : > { %v1997_v48 = vadd.f32 %v1996_v46, %v1971_v35 }
 0x7d2   : > { %3026 = vtanh.f32 %v1997_v48 }
 0x7dc   : > { %v3027_v51 = vpop.eup %3026 }
 0x7dd   : > { %v2000_v52 = vmul.f32 %v3027_v51, %v1999_v49 }
 0x7df   : > { %v3743_v54 = vadd.f32 %v2004_v47, %v2000_v52 }
 0x7e1   : > { %v2006_v12 = vpack.c.bf16 %v3743_v54, %v3743_v54  ;;  %v3752_v1 = vsel %vm1217_vm2, %v2129_v57, %v3743_v54  ;;  %v2124_v60 = vrot.slane %v3743_v54, 6 }
 0x7e3   : > { %v2008_v13 = vrot.slane %v2006_v12, 2 }
 0x7e5   : > { %2043 = vmatmul.mubr.bf16.vlgmr.msra.gmra.mrb[36].mxu0 %v2008_v13  ;;  %2764 = vmatmul.mubr.bf16.vlgmr.msra.gmra.mrb[36].mxu1 %v2008_v13 }
 0x7e6   : > { %2783 = vmatprep.mubr.msk.bf16.mxu0 %vm3121_vm0, %v3119_v3  ;;  %2768 = vmatpush3.bf16.msra.mxu0 %v2950_v56 }
 0x7e7   : > { %2769 = vmatprep.subr.bf16.mxu0 %v3119_v3 }
 0x7ea   : > { %2770 = vmatpush3.bf16.msra.mxu0 %v2951_v45 }
 0x7eb   : > { %2771 = vmatprep.subr.bf16.mxu0 %v3119_v3 }
 0x7ee   : > { %2772 = vmatpush3.bf16.msra.mxu0 %v2952_v59 }
 0x7ef   : > { %2773 = vmatprep.subr.bf16.mxu0 %v3119_v3 }
 0x7f2   : > { %2774 = vmatpush3.bf16.msra.mxu0 %v2953_v14 }
 0x7f3   : > { %2775 = vmatprep.subr.bf16.mxu0 %v3119_v3 }
 0x7f6   : > { %2776 = vmatpush3.bf16.msra.mxu0 %v2954_v15 }
 0x7f7   : > { %2777 = vmatprep.subr.bf16.mxu0 %v3119_v3 }
 0x7fa   : > { %2778 = vmatpush3.bf16.msra.mxu0 %v2955_v16 }
 0x7fb   : > { %2779 = vmatprep.subr.bf16.mxu0 %v3119_v3 }
 0x7fe   : > { %2780 = vmatpush3.bf16.msra.mxu0 %v2956_v34 }
 0x7ff   : > { %2781 = vmatprep.subr.bf16.mxu0 %v3119_v3 }
 0x802   : > { %2782 = vmatpush3.bf16.msra.mxu0 %v2957_v17 }
 0x8b8   : > { %v2044_v18 = vpop.f32.mrb[36].mxu0  ;;  %v2085_v19 = vpop.f32.mrb[36].mxu1 }
 0x8b9   : > { %v2095_v20 = vrot.slane %v2044_v18, 2  ;;  %v2046_v22 = vpop.f32.mrb[37].mxu0  ;;  %v2765_v23 = vpop.f32.mrb[37].mxu1  ;;  %v2114_v32 = vadd.f32 %v3658_v27, %v2085_v19 }
 0x8ba   : > { %v2105_v26 = vrot.slane %v2046_v22, 2  ;;  %v2048_v29 = vpop.f32.mrb[38].mxu0  ;;  %v2088_v9 = vpop.f32.mrb[38].mxu1 }
 0x8bb   : > { %v2097_v21 = vadd.f32 %v2095_v20, %v2091_v25  ;;  %v2049_v38 = vpop.f32.mrb[39].mxu0  ;;  %v2766_v39 = vpop.f32.mrb[39].mxu1  ;;  %v2116_v53 = vrot.slane %v2114_v32, 2 }
 0x8bc   : > { %v2107_v40 = vadd.f32 %v2105_v26, %v2092_v37 }
 0x8bd   : > { %v2454_v41 = vmul.f32 -1.442695, %v2097_v21 }
 0x8be   : > { %v2455_v42 = vmul.f32 -1.442695, %v2107_v40 }
 0x8bf   : > { %3028 = vpow2.f32 %v2454_v41 }
 0x8c0   : > { %3030 = vpow2.f32 %v2455_v42 }
 0x8c9   : > { %v3029_v3 = vpop.eup %3028 }
 0x8ca   : > { %v3031_v43 = vpop.eup %3030  ;;  %v2101_v4 = vadd.f32 1.0, %v3029_v3 }
 0x8cb   : > { %v2111_v55 = vadd.f32 1.0, %v3031_v43 }
 0x8cc   : > { %3032 = vrcp.f32 %v2101_v4 }
 0x8cd   : > { %3034 = vrcp.f32 %v2111_v55 }
 0x8d6   : > { %v3033_v58 = vpop.eup %3032 }
 0x8d7   : > { %v3035_v24 = vpop.eup %3034  ;;  %v2118_v61 = vmul.f32 %v3033_v58, %v2116_v53 }
 0x8d8   : > { %v2126_v63 = vmul.f32 %v3035_v24, %v2124_v60  ;;  %v2121_v2 = vsub.f32 1.0, %v3035_v24 }
 0x8d9   : > { %v2119_v0 = vadd.f32 %v2118_v61, %v2093_v62 }
 0x8db   : > { %3036 = vtanh.f32 %v2119_v0 }
 0x8e5   : > { %v3037_v5 = vpop.eup %3036 }
 0x8e6   : > { %v2122_v6 = vmul.f32 %v3037_v5, %v2121_v2 }
 0x8e8   : > { %v2127_v7 = vadd.f32 %v2126_v63, %v2122_v6 }
 0x8ea   : > { %2128 = vst [vmem:[#allocation2 - $0x4] sm:$0xc0] %v2127_v7  ;;  %v2131_v8 = vsel %vm1219_vm3, %v3752_v1, %v2127_v7 }
 0x8eb   : > { %v2134_v27 = vpack.c.bf16 %v2131_v8, %v2131_v8 }
 0x8ed   : > { %2784 = vmatmul.mubr.bf16.vlgmr.msra.gmra.mrb[40].mxu0 %v2134_v27 }
 0x9c0   : > { %v2240_v50 = vpop.f32.mrb[40].mxu0 }
 0x9c1   : > { %v2241_v11 = vadd.f32 %v2456_v10, %v2240_v50  ;;  %v2785_v28 = vpop.f32.mrb[41].mxu0 }
 0x9c2   : > { %v2243_v30 = vpop.f32.mrb[42].mxu0 }
 0x9c3   : > { %v2465_v31 = vmul.f32 -1.442695, %v2241_v11  ;;  %v2786_v33 = vpop.f32.mrb[43].mxu0 }
 0x9c5   : > { %3038 = vpow2.f32 %v2465_v31 }
 0x9cf   : > { %v3039_v36 = vpop.eup %3038 }
 0x9d0   : > { %v2249_v44 = vadd.f32 1.0, %v3039_v36 }
 0x9d2   : > { %3040 = vrcp.f32 %v2249_v44 }
 0x9dc   : > { %v3041_v46 = vpop.eup %3040 }
 0x9dd   : > { %2252 = vst [vmem:[%s3255_s17] sm:$0xff] %v3041_v46 }
 0x9de PF: > { %s19_s24 = sadd.s32 1, %s3112_s24  }
 0x9df   : > { %p16_p10 = scmp.ge.s32.totalorder %s19_s24, 4  }
 0x9e1   :  { %18 = sbr.rel (!%p16_p10) target bundleno = 2 (0x2), region = 96 }
 0x9e8   :  { %2272 = vsyncpa [#allocation6], 1 }
 0x9e9   :  { %2274 = vsyncpa [#allocation6 + $0x1], 1 }
 0x9ea   :  { %2275 = vsyncpa [#allocation8], 1 }

</bundles_post_ra>
